<compile_context>
chip_gen: v7x
topology: tpu7x:2x2x1
jax: 0.10.0
libtpu: 0.0.40
codegen_flags: <defaults>
</compile_context>

<pallas_src>
import math
import jax
import jax.numpy as jnp
from jax.experimental import pallas as pl
from jax.experimental.pallas import tpu as pltpu  # noqa: F401  (TPU backend assumed)

# ---- small, module-consistent sizes -----------------------------------------
B, S, D = 2, 8, 32          # batch, seq, embed_dim
H = 4                       # num_heads
Dh = D // H                 # head_dim
HID = 64                    # hidden_size of FFN
EPS = 1e-5                  # nn.LayerNorm default eps


def _layernorm(x, g, b):
    mu = jnp.mean(x, axis=-1, keepdims=True)
    var = jnp.mean((x - mu) ** 2, axis=-1, keepdims=True)
    return (x - mu) * jax.lax.rsqrt(var + EPS) * g + b


def _erf(x):
    # Abramowitz & Stegun 7.1.26, |abs err| < 1.5e-7 (f32-accurate); uses only
    # abs/exp/mul/add/div/where so it lowers cleanly on Mosaic.
    a1, a2, a3, a4, a5 = 0.254829592, -0.284496736, 1.421413741, -1.453152027, 1.061405429
    p = 0.3275911
    ax = jnp.abs(x)
    t = 1.0 / (1.0 + p * ax)
    poly = ((((a5 * t + a4) * t + a3) * t + a2) * t + a1) * t
    y = 1.0 - poly * jnp.exp(-ax * ax)
    return jnp.where(x >= 0.0, y, -y)


def _gelu_exact(x):
    # PyTorch nn.GELU default is the exact erf form (not tanh approximation).
    return 0.5 * x * (1.0 + _erf(x * (1.0 / math.sqrt(2.0))))


def encoder_block_kernel(x_ref, cos_ref, sin_ref, mask_ref,
                         ln1g_ref, ln1b_ref,
                         wq_ref, wqr_ref, wk_ref, wkr_ref, wv_ref,
                         bq_ref, bqr_ref, bk_ref, bkr_ref, bv_ref,
                         wo_ref, bo_ref, ln2g_ref, ln2b_ref,
                         w1_ref, b1_ref, w2_ref, b2_ref,
                         o_ref):
    x = x_ref[...]                       # (N, D) f32, N = B*S
    cos_t = cos_ref[...]                 # (N, D) rotary cos table (tiled per head/batch)
    sin_t = sin_ref[...]                 # (N, D) rotary sin table
    mask = mask_ref[...]                 # (N, N) block-diagonal 0 / -1e30 batch mask

    # --------- attention branch: LN1 -> QKV (+rotate-half proj) -> SDPA ------
    xn = _layernorm(x, ln1g_ref[0], ln1b_ref[0])
    xn_b = xn.astype(jnp.bfloat16)       # bf16 operand for all weight matmuls

    def proj(w_ref, b_ref):
        return jnp.dot(xn_b, w_ref[...], preferred_element_type=jnp.float32) + b_ref[0]

    # rotary on the full (N, D) slabs: q*cos + rotate_half(q)*sin, where
    # rotate_half is pre-folded (permutation + sign) into Wq_rh / Wk_rh.
    q = proj(wq_ref, bq_ref) * cos_t + proj(wqr_ref, bqr_ref) * sin_t
    k = proj(wk_ref, bk_ref) * cos_t + proj(wkr_ref, bkr_ref) * sin_t
    v = proj(wv_ref, bv_ref)

    scale = 1.0 / math.sqrt(Dh)
    attn = jnp.zeros(x.shape, jnp.float32)
    for h in range(H):                   # static unroll over heads (H = 4)
        sl = slice(h * Dh, (h + 1) * Dh)
        qh, kh, vh = q[:, sl], k[:, sl], v[:, sl]               # (N, Dh) f32
        # non-causal full-window attention; block-diag mask keeps batches separate
        s = jax.lax.dot_general(qh, kh, (((1,), (1,)), ((), ())),
                                preferred_element_type=jnp.float32) * scale + mask
        s = s - jnp.max(s, axis=-1, keepdims=True)
        p = jnp.exp(s)
        p = p * pl.reciprocal(jnp.sum(p, axis=-1, keepdims=True), approx=True)
        ctx = jnp.dot(p, vh, preferred_element_type=jnp.float32)  # (N, Dh)
        # fold the head concat into the out-projection: attn += ctx @ Wo[h]
        attn = attn + jnp.dot(ctx.astype(jnp.bfloat16), wo_ref[h],
                              preferred_element_type=jnp.float32)
    attn = attn + bo_ref[0]

    # TODO(synk): nn.Dropout (skip drops, attention dropout, FFN dropout) is identity
    # here (eval-mode semantics); training-mode stochastic dropout is not implemented.
    x1 = x + attn

    # --------- feedforward branch: LN2 -> Linear -> GELU(erf) -> Linear ------
    xn2 = _layernorm(x1, ln2g_ref[0], ln2b_ref[0])
    hdn = jnp.dot(xn2.astype(jnp.bfloat16), w1_ref[...],
                  preferred_element_type=jnp.float32) + b1_ref[0]
    hdn = _gelu_exact(hdn)
    ff = jnp.dot(hdn.astype(jnp.bfloat16), w2_ref[...],
                 preferred_element_type=jnp.float32) + b2_ref[0]

    o_ref[...] = (x1 + ff).astype(o_ref.dtype)


def encoder_block(x, rotary_freqs, params):
    """x: (B,S,D) f32; rotary_freqs: (S, Dh//2) angles; params: tuple of 12 arrays."""
    (ln1g, ln1b, wqkv, bqkv, wo, bo, ln2g, ln2b, w1, b1, w2, b2) = params
    B_, S_, D_ = x.shape
    N = B_ * S_

    # split fused QKV projection (wrapper-side layout plumbing)
    wq, wk, wv = wqkv[:, :D_], wqkv[:, D_:2 * D_], wqkv[:, 2 * D_:]
    bq, bk, bv = bqkv[:, :D_], bqkv[:, D_:2 * D_], bqkv[:, 2 * D_:]

    # fold rotate_half (per-head circular shift by Dh/2 with sign flip on the
    # first half) into permuted / signed copies of Wq, Wk and their biases.
    i = jnp.arange(D_) % Dh
    hh = jnp.arange(D_) // Dh
    perm = hh * Dh + (i + Dh // 2) % Dh
    sign = jnp.where(i < Dh // 2, -1.0, 1.0).astype(jnp.float32)
    wq_rh, bq_rh = wq[:, perm] * sign[None, :], bq[:, perm] * sign[None, :]
    wk_rh, bk_rh = wk[:, perm] * sign[None, :], bk[:, perm] * sign[None, :]

    # rotary tables expanded to (N, D): (S, Dh) rotate-half table tiled over
    # heads (lane axis) and batch (row axis).
    cos_h = jnp.cos(rotary_freqs)
    sin_h = jnp.sin(rotary_freqs)                               # (S, Dh//2)
    cos_t = jnp.tile(jnp.concatenate([cos_h, cos_h], -1), (B_, H))   # (N, D)
    sin_t = jnp.tile(jnp.concatenate([sin_h, sin_h], -1), (B_, H))   # (N, D)

    # block-diagonal mask keeping attention within each batch element
    bid = jnp.arange(N) // S_
    mask = jnp.where(bid[:, None] == bid[None, :], 0.0, -1e30).astype(jnp.float32)

    bf = lambda w: w.astype(jnp.bfloat16)
    wo_heads = bf(wo.reshape(H, Dh, D_))   # (H, Dh, D): kernel indexes leading axis
    x2d = x.reshape(N, D_)

    out2d = pl.pallas_call(
        encoder_block_kernel,
        out_shape=jax.ShapeDtypeStruct((N, D_), x.dtype),
    )(x2d, cos_t, sin_t, mask,
      ln1g, ln1b,
      bf(wq), bf(wq_rh), bf(wk), bf(wk_rh), bf(wv),
      bq, bq_rh, bk, bk_rh, bv,
      wo_heads, bo,
      ln2g, ln2b,
      bf(w1), b1, bf(w2), b2)
    return out2d.reshape(B_, S_, D_)


if __name__ == "__main__":
    key = jax.random.PRNGKey(0)
    ks = jax.random.split(key, 6)

    x = jax.random.normal(ks[0], (B, S, D), jnp.float32)

    # rotary frequencies: theta=10000, angles of shape (S, Dh//2)
    inv_freq = 1.0 / (10000.0 ** (jnp.arange(0, Dh, 2, dtype=jnp.float32) / Dh))
    pos = jnp.arange(S, dtype=jnp.float32)
    rotary_freqs = pos[:, None] * inv_freq[None, :]       # (S, Dh//2)

    def w(k, shape, scale=0.02):
        return scale * jax.random.normal(k, shape, jnp.float32)

    params = (
        jnp.ones((1, D), jnp.float32), jnp.zeros((1, D), jnp.float32),      # ln1
        w(ks[1], (D, 3 * D)), jnp.zeros((1, 3 * D), jnp.float32),           # qkv proj
        w(ks[2], (D, D)), jnp.zeros((1, D), jnp.float32),                   # out proj
        jnp.ones((1, D), jnp.float32), jnp.zeros((1, D), jnp.float32),      # ln2
        w(ks[3], (D, HID)), jnp.zeros((1, HID), jnp.float32),               # ffn up
        w(ks[4], (HID, D)), jnp.zeros((1, D), jnp.float32),                 # ffn down
    )

    out = encoder_block(x, rotary_freqs, params)
    jax.block_until_ready(out)
    assert out.shape == (B, S, D) and out.dtype == jnp.float32
    print("KERNEL_OK")
</pallas_src>

<mosaic_0001>
module attributes {stable_mosaic.version = 11 : i64} {
  func.func @encoder_block_kernel(%arg0: memref<16x32xf32, #tpu.memory_space<vmem>>, %arg1: memref<16x32xf32, #tpu.memory_space<vmem>>, %arg2: memref<16x32xf32, #tpu.memory_space<vmem>>, %arg3: memref<16x16xf32, #tpu.memory_space<vmem>>, %arg4: memref<1x32xf32, #tpu.memory_space<vmem>>, %arg5: memref<1x32xf32, #tpu.memory_space<vmem>>, %arg6: memref<32x32xbf16, #tpu.memory_space<vmem>>, %arg7: memref<32x32xbf16, #tpu.memory_space<vmem>>, %arg8: memref<32x32xbf16, #tpu.memory_space<vmem>>, %arg9: memref<32x32xbf16, #tpu.memory_space<vmem>>, %arg10: memref<32x32xbf16, #tpu.memory_space<vmem>>, %arg11: memref<1x32xf32, #tpu.memory_space<vmem>>, %arg12: memref<1x32xf32, #tpu.memory_space<vmem>>, %arg13: memref<1x32xf32, #tpu.memory_space<vmem>>, %arg14: memref<1x32xf32, #tpu.memory_space<vmem>>, %arg15: memref<1x32xf32, #tpu.memory_space<vmem>>, %arg16: memref<4x8x32xbf16, #tpu.memory_space<vmem>>, %arg17: memref<1x32xf32, #tpu.memory_space<vmem>>, %arg18: memref<1x32xf32, #tpu.memory_space<vmem>>, %arg19: memref<1x32xf32, #tpu.memory_space<vmem>>, %arg20: memref<32x64xbf16, #tpu.memory_space<vmem>>, %arg21: memref<1x64xf32, #tpu.memory_space<vmem>>, %arg22: memref<64x32xbf16, #tpu.memory_space<vmem>>, %arg23: memref<1x32xf32, #tpu.memory_space<vmem>>, %arg24: memref<16x32xf32, #tpu.memory_space<vmem>>) attributes {dimension_semantics = [], scalar_prefetch = 0 : i64, scratch_operands = 0 : i64, tpu.core_type = #tpu.core_type<tc>} {
    %c0 = arith.constant 0 : index
    %c0_0 = arith.constant 0 : index
    %0 = vector.load %arg0[%c0, %c0_0] : memref<16x32xf32, #tpu.memory_space<vmem>>, vector<16x32xf32>
    %c0_1 = arith.constant 0 : index
    %c0_2 = arith.constant 0 : index
    %1 = vector.load %arg1[%c0_1, %c0_2] : memref<16x32xf32, #tpu.memory_space<vmem>>, vector<16x32xf32>
    %c0_3 = arith.constant 0 : index
    %c0_4 = arith.constant 0 : index
    %2 = vector.load %arg2[%c0_3, %c0_4] : memref<16x32xf32, #tpu.memory_space<vmem>>, vector<16x32xf32>
    %c0_5 = arith.constant 0 : index
    %c0_6 = arith.constant 0 : index
    %3 = vector.load %arg3[%c0_5, %c0_6] : memref<16x16xf32, #tpu.memory_space<vmem>>, vector<16x16xf32>
    %c0_7 = arith.constant 0 : index
    %c0_8 = arith.constant 0 : index
    %4 = vector.load %arg4[%c0_7, %c0_8] : memref<1x32xf32, #tpu.memory_space<vmem>>, vector<1x32xf32>
    %5 = vector.shape_cast %4 : vector<1x32xf32> to vector<32xf32>
    %c0_9 = arith.constant 0 : index
    %c0_10 = arith.constant 0 : index
    %6 = vector.load %arg5[%c0_9, %c0_10] : memref<1x32xf32, #tpu.memory_space<vmem>>, vector<1x32xf32>
    %7 = vector.shape_cast %6 : vector<1x32xf32> to vector<32xf32>
    %cst = arith.constant dense<0.000000e+00> : vector<16xf32>
    %8 = vector.multi_reduction <add>, %0, %cst [1] : vector<16x32xf32> to vector<16xf32>
    %9 = vector.shape_cast %8 : vector<16xf32> to vector<16x1xf32>
    %cst_11 = arith.constant 3.200000e+01 : f32
    %10 = vector.broadcast %cst_11 : f32 to vector<16x1xf32>
    %11 = arith.divf %9, %10 : vector<16x1xf32>
    %12 = vector.broadcast %11 : vector<16x1xf32> to vector<16x32xf32>
    %13 = arith.subf %0, %12 : vector<16x32xf32>
    %14 = arith.mulf %13, %13 : vector<16x32xf32>
    %cst_12 = arith.constant dense<0.000000e+00> : vector<16xf32>
    %15 = vector.multi_reduction <add>, %14, %cst_12 [1] : vector<16x32xf32> to vector<16xf32>
    %16 = vector.shape_cast %15 : vector<16xf32> to vector<16x1xf32>
    %cst_13 = arith.constant 3.200000e+01 : f32
    %17 = vector.broadcast %cst_13 : f32 to vector<16x1xf32>
    %18 = arith.divf %16, %17 : vector<16x1xf32>
    %19 = vector.broadcast %11 : vector<16x1xf32> to vector<16x32xf32>
    %20 = arith.subf %0, %19 : vector<16x32xf32>
    %cst_14 = arith.constant 9.99999974E-6 : f32
    %21 = vector.broadcast %cst_14 : f32 to vector<16x1xf32>
    %22 = arith.addf %18, %21 : vector<16x1xf32>
    %23 = math.rsqrt %22 : vector<16x1xf32>
    %24 = vector.broadcast %23 : vector<16x1xf32> to vector<16x32xf32>
    %25 = arith.mulf %20, %24 : vector<16x32xf32>
    %26 = vector.shape_cast %5 : vector<32xf32> to vector<1x32xf32>
    %27 = vector.broadcast %26 : vector<1x32xf32> to vector<16x32xf32>
    %28 = arith.mulf %25, %27 : vector<16x32xf32>
    %29 = vector.shape_cast %7 : vector<32xf32> to vector<1x32xf32>
    %30 = vector.broadcast %29 : vector<1x32xf32> to vector<16x32xf32>
    %31 = arith.addf %28, %30 : vector<16x32xf32>
    %32 = arith.truncf %31 : vector<16x32xf32> to vector<16x32xbf16>
    %c0_15 = arith.constant 0 : index
    %c0_16 = arith.constant 0 : index
    %33 = vector.load %arg6[%c0_15, %c0_16] : memref<32x32xbf16, #tpu.memory_space<vmem>>, vector<32x32xbf16>
    %cst_17 = arith.constant dense<0.000000e+00> : vector<16x32xf32>
    %34 = tpu.matmul %32, %33, %cst_17 {dimension_numbers = #tpu.dot_dimension_numbers<[1], [0], [0], [1], [0, 0, 1, 1], [], []>} : vector<16x32xbf16>, vector<32x32xbf16>, vector<16x32xf32> -> vector<16x32xf32>
    %c0_18 = arith.constant 0 : index
    %c0_19 = arith.constant 0 : index
    %35 = vector.load %arg11[%c0_18, %c0_19] : memref<1x32xf32, #tpu.memory_space<vmem>>, vector<1x32xf32>
    %36 = vector.shape_cast %35 : vector<1x32xf32> to vector<32xf32>
    %37 = vector.shape_cast %36 : vector<32xf32> to vector<1x32xf32>
    %38 = vector.broadcast %37 : vector<1x32xf32> to vector<16x32xf32>
    %39 = arith.addf %34, %38 : vector<16x32xf32>
    %40 = arith.mulf %39, %1 : vector<16x32xf32>
    %c0_20 = arith.constant 0 : index
    %c0_21 = arith.constant 0 : index
    %41 = vector.load %arg7[%c0_20, %c0_21] : memref<32x32xbf16, #tpu.memory_space<vmem>>, vector<32x32xbf16>
    %cst_22 = arith.constant dense<0.000000e+00> : vector<16x32xf32>
    %42 = tpu.matmul %32, %41, %cst_22 {dimension_numbers = #tpu.dot_dimension_numbers<[1], [0], [0], [1], [0, 0, 1, 1], [], []>} : vector<16x32xbf16>, vector<32x32xbf16>, vector<16x32xf32> -> vector<16x32xf32>
    %c0_23 = arith.constant 0 : index
    %c0_24 = arith.constant 0 : index
    %43 = vector.load %arg12[%c0_23, %c0_24] : memref<1x32xf32, #tpu.memory_space<vmem>>, vector<1x32xf32>
    %44 = vector.shape_cast %43 : vector<1x32xf32> to vector<32xf32>
    %45 = vector.shape_cast %44 : vector<32xf32> to vector<1x32xf32>
    %46 = vector.broadcast %45 : vector<1x32xf32> to vector<16x32xf32>
    %47 = arith.addf %42, %46 : vector<16x32xf32>
    %48 = arith.mulf %47, %2 : vector<16x32xf32>
    %49 = arith.addf %40, %48 : vector<16x32xf32>
    %c0_25 = arith.constant 0 : index
    %c0_26 = arith.constant 0 : index
    %50 = vector.load %arg8[%c0_25, %c0_26] : memref<32x32xbf16, #tpu.memory_space<vmem>>, vector<32x32xbf16>
    %cst_27 = arith.constant dense<0.000000e+00> : vector<16x32xf32>
    %51 = tpu.matmul %32, %50, %cst_27 {dimension_numbers = #tpu.dot_dimension_numbers<[1], [0], [0], [1], [0, 0, 1, 1], [], []>} : vector<16x32xbf16>, vector<32x32xbf16>, vector<16x32xf32> -> vector<16x32xf32>
    %c0_28 = arith.constant 0 : index
    %c0_29 = arith.constant 0 : index
    %52 = vector.load %arg13[%c0_28, %c0_29] : memref<1x32xf32, #tpu.memory_space<vmem>>, vector<1x32xf32>
    %53 = vector.shape_cast %52 : vector<1x32xf32> to vector<32xf32>
    %54 = vector.shape_cast %53 : vector<32xf32> to vector<1x32xf32>
    %55 = vector.broadcast %54 : vector<1x32xf32> to vector<16x32xf32>
    %56 = arith.addf %51, %55 : vector<16x32xf32>
    %57 = arith.mulf %56, %1 : vector<16x32xf32>
    %c0_30 = arith.constant 0 : index
    %c0_31 = arith.constant 0 : index
    %58 = vector.load %arg9[%c0_30, %c0_31] : memref<32x32xbf16, #tpu.memory_space<vmem>>, vector<32x32xbf16>
    %cst_32 = arith.constant dense<0.000000e+00> : vector<16x32xf32>
    %59 = tpu.matmul %32, %58, %cst_32 {dimension_numbers = #tpu.dot_dimension_numbers<[1], [0], [0], [1], [0, 0, 1, 1], [], []>} : vector<16x32xbf16>, vector<32x32xbf16>, vector<16x32xf32> -> vector<16x32xf32>
    %c0_33 = arith.constant 0 : index
    %c0_34 = arith.constant 0 : index
    %60 = vector.load %arg14[%c0_33, %c0_34] : memref<1x32xf32, #tpu.memory_space<vmem>>, vector<1x32xf32>
    %61 = vector.shape_cast %60 : vector<1x32xf32> to vector<32xf32>
    %62 = vector.shape_cast %61 : vector<32xf32> to vector<1x32xf32>
    %63 = vector.broadcast %62 : vector<1x32xf32> to vector<16x32xf32>
    %64 = arith.addf %59, %63 : vector<16x32xf32>
    %65 = arith.mulf %64, %2 : vector<16x32xf32>
    %66 = arith.addf %57, %65 : vector<16x32xf32>
    %c0_35 = arith.constant 0 : index
    %c0_36 = arith.constant 0 : index
    %67 = vector.load %arg10[%c0_35, %c0_36] : memref<32x32xbf16, #tpu.memory_space<vmem>>, vector<32x32xbf16>
    %cst_37 = arith.constant dense<0.000000e+00> : vector<16x32xf32>
    %68 = tpu.matmul %32, %67, %cst_37 {dimension_numbers = #tpu.dot_dimension_numbers<[1], [0], [0], [1], [0, 0, 1, 1], [], []>} : vector<16x32xbf16>, vector<32x32xbf16>, vector<16x32xf32> -> vector<16x32xf32>
    %c0_38 = arith.constant 0 : index
    %c0_39 = arith.constant 0 : index
    %69 = vector.load %arg15[%c0_38, %c0_39] : memref<1x32xf32, #tpu.memory_space<vmem>>, vector<1x32xf32>
    %70 = vector.shape_cast %69 : vector<1x32xf32> to vector<32xf32>
    %71 = vector.shape_cast %70 : vector<32xf32> to vector<1x32xf32>
    %72 = vector.broadcast %71 : vector<1x32xf32> to vector<16x32xf32>
    %73 = arith.addf %68, %72 : vector<16x32xf32>
    %cst_40 = arith.constant 0.000000e+00 : f32
    %74 = vector.broadcast %cst_40 : f32 to vector<16x32xf32>
    %75 = vector.extract_strided_slice %49 {offsets = [0, 0], sizes = [16, 8], strides = [1, 1]} : vector<16x32xf32> to vector<16x8xf32>
    %76 = vector.extract_strided_slice %66 {offsets = [0, 0], sizes = [16, 8], strides = [1, 1]} : vector<16x32xf32> to vector<16x8xf32>
    %77 = vector.extract_strided_slice %73 {offsets = [0, 0], sizes = [16, 8], strides = [1, 1]} : vector<16x32xf32> to vector<16x8xf32>
    %cst_41 = arith.constant dense<0.000000e+00> : vector<16x16xf32>
    %78 = tpu.matmul %75, %76, %cst_41 {dimension_numbers = #tpu.dot_dimension_numbers<[1], [1], [0], [0], [0, 0, 1, 0], [], []>} : vector<16x8xf32>, vector<16x8xf32>, vector<16x16xf32> -> vector<16x16xf32>
    %cst_42 = arith.constant 0.353553385 : f32
    %79 = vector.broadcast %cst_42 : f32 to vector<16x16xf32>
    %80 = arith.mulf %78, %79 : vector<16x16xf32>
    %81 = arith.addf %80, %3 : vector<16x16xf32>
    %cst_43 = arith.constant dense<0xFF800000> : vector<16xf32>
    %82 = vector.multi_reduction <maximumf>, %81, %cst_43 [1] : vector<16x16xf32> to vector<16xf32>
    %83 = vector.shape_cast %82 : vector<16xf32> to vector<16x1xf32>
    %84 = vector.broadcast %83 : vector<16x1xf32> to vector<16x16xf32>
    %85 = arith.subf %81, %84 : vector<16x16xf32>
    %86 = math.exp %85 : vector<16x16xf32>
    %cst_44 = arith.constant dense<0.000000e+00> : vector<16xf32>
    %87 = vector.multi_reduction <add>, %86, %cst_44 [1] : vector<16x16xf32> to vector<16xf32>
    %88 = vector.shape_cast %87 : vector<16xf32> to vector<16x1xf32>
    %89 = tpu.reciprocal %88 {approx = true} : vector<16x1xf32> -> vector<16x1xf32>
    %90 = vector.broadcast %89 : vector<16x1xf32> to vector<16x16xf32>
    %91 = arith.mulf %86, %90 : vector<16x16xf32>
    %cst_45 = arith.constant dense<0.000000e+00> : vector<16x8xf32>
    %92 = tpu.matmul %91, %77, %cst_45 {dimension_numbers = #tpu.dot_dimension_numbers<[1], [0], [0], [1], [0, 0, 1, 1], [], []>} : vector<16x16xf32>, vector<16x8xf32>, vector<16x8xf32> -> vector<16x8xf32>
    %93 = arith.truncf %92 : vector<16x8xf32> to vector<16x8xbf16>
    %c0_46 = arith.constant 0 : index
    %c0_47 = arith.constant 0 : index
    %c0_48 = arith.constant 0 : index
    %94 = vector.load %arg16[%c0_46, %c0_47, %c0_48] : memref<4x8x32xbf16, #tpu.memory_space<vmem>>, vector<1x8x32xbf16>
    %95 = vector.shape_cast %94 : vector<1x8x32xbf16> to vector<8x32xbf16>
    %cst_49 = arith.constant dense<0.000000e+00> : vector<16x32xf32>
    %96 = tpu.matmul %93, %95, %cst_49 {dimension_numbers = #tpu.dot_dimension_numbers<[1], [0], [0], [1], [0, 0, 1, 1], [], []>} : vector<16x8xbf16>, vector<8x32xbf16>, vector<16x32xf32> -> vector<16x32xf32>
    %97 = arith.addf %74, %96 : vector<16x32xf32>
    %98 = vector.extract_strided_slice %49 {offsets = [0, 8], sizes = [16, 8], strides = [1, 1]} : vector<16x32xf32> to vector<16x8xf32>
    %99 = vector.extract_strided_slice %66 {offsets = [0, 8], sizes = [16, 8], strides = [1, 1]} : vector<16x32xf32> to vector<16x8xf32>
    %100 = vector.extract_strided_slice %73 {offsets = [0, 8], sizes = [16, 8], strides = [1, 1]} : vector<16x32xf32> to vector<16x8xf32>
    %cst_50 = arith.constant dense<0.000000e+00> : vector<16x16xf32>
    %101 = tpu.matmul %98, %99, %cst_50 {dimension_numbers = #tpu.dot_dimension_numbers<[1], [1], [0], [0], [0, 0, 1, 0], [], []>} : vector<16x8xf32>, vector<16x8xf32>, vector<16x16xf32> -> vector<16x16xf32>
    %cst_51 = arith.constant 0.353553385 : f32
    %102 = vector.broadcast %cst_51 : f32 to vector<16x16xf32>
    %103 = arith.mulf %101, %102 : vector<16x16xf32>
    %104 = arith.addf %103, %3 : vector<16x16xf32>
    %cst_52 = arith.constant dense<0xFF800000> : vector<16xf32>
    %105 = vector.multi_reduction <maximumf>, %104, %cst_52 [1] : vector<16x16xf32> to vector<16xf32>
    %106 = vector.shape_cast %105 : vector<16xf32> to vector<16x1xf32>
    %107 = vector.broadcast %106 : vector<16x1xf32> to vector<16x16xf32>
    %108 = arith.subf %104, %107 : vector<16x16xf32>
    %109 = math.exp %108 : vector<16x16xf32>
    %cst_53 = arith.constant dense<0.000000e+00> : vector<16xf32>
    %110 = vector.multi_reduction <add>, %109, %cst_53 [1] : vector<16x16xf32> to vector<16xf32>
    %111 = vector.shape_cast %110 : vector<16xf32> to vector<16x1xf32>
    %112 = tpu.reciprocal %111 {approx = true} : vector<16x1xf32> -> vector<16x1xf32>
    %113 = vector.broadcast %112 : vector<16x1xf32> to vector<16x16xf32>
    %114 = arith.mulf %109, %113 : vector<16x16xf32>
    %cst_54 = arith.constant dense<0.000000e+00> : vector<16x8xf32>
    %115 = tpu.matmul %114, %100, %cst_54 {dimension_numbers = #tpu.dot_dimension_numbers<[1], [0], [0], [1], [0, 0, 1, 1], [], []>} : vector<16x16xf32>, vector<16x8xf32>, vector<16x8xf32> -> vector<16x8xf32>
    %116 = arith.truncf %115 : vector<16x8xf32> to vector<16x8xbf16>
    %c1 = arith.constant 1 : index
    %c0_55 = arith.constant 0 : index
    %c0_56 = arith.constant 0 : index
    %117 = vector.load %arg16[%c1, %c0_55, %c0_56] : memref<4x8x32xbf16, #tpu.memory_space<vmem>>, vector<1x8x32xbf16>
    %118 = vector.shape_cast %117 : vector<1x8x32xbf16> to vector<8x32xbf16>
    %cst_57 = arith.constant dense<0.000000e+00> : vector<16x32xf32>
    %119 = tpu.matmul %116, %118, %cst_57 {dimension_numbers = #tpu.dot_dimension_numbers<[1], [0], [0], [1], [0, 0, 1, 1], [], []>} : vector<16x8xbf16>, vector<8x32xbf16>, vector<16x32xf32> -> vector<16x32xf32>
    %120 = arith.addf %97, %119 : vector<16x32xf32>
    %121 = vector.extract_strided_slice %49 {offsets = [0, 16], sizes = [16, 8], strides = [1, 1]} : vector<16x32xf32> to vector<16x8xf32>
    %122 = vector.extract_strided_slice %66 {offsets = [0, 16], sizes = [16, 8], strides = [1, 1]} : vector<16x32xf32> to vector<16x8xf32>
    %123 = vector.extract_strided_slice %73 {offsets = [0, 16], sizes = [16, 8], strides = [1, 1]} : vector<16x32xf32> to vector<16x8xf32>
    %cst_58 = arith.constant dense<0.000000e+00> : vector<16x16xf32>
    %124 = tpu.matmul %121, %122, %cst_58 {dimension_numbers = #tpu.dot_dimension_numbers<[1], [1], [0], [0], [0, 0, 1, 0], [], []>} : vector<16x8xf32>, vector<16x8xf32>, vector<16x16xf32> -> vector<16x16xf32>
    %cst_59 = arith.constant 0.353553385 : f32
    %125 = vector.broadcast %cst_59 : f32 to vector<16x16xf32>
    %126 = arith.mulf %124, %125 : vector<16x16xf32>
    %127 = arith.addf %126, %3 : vector<16x16xf32>
    %cst_60 = arith.constant dense<0xFF800000> : vector<16xf32>
    %128 = vector.multi_reduction <maximumf>, %127, %cst_60 [1] : vector<16x16xf32> to vector<16xf32>
    %129 = vector.shape_cast %128 : vector<16xf32> to vector<16x1xf32>
    %130 = vector.broadcast %129 : vector<16x1xf32> to vector<16x16xf32>
    %131 = arith.subf %127, %130 : vector<16x16xf32>
    %132 = math.exp %131 : vector<16x16xf32>
    %cst_61 = arith.constant dense<0.000000e+00> : vector<16xf32>
    %133 = vector.multi_reduction <add>, %132, %cst_61 [1] : vector<16x16xf32> to vector<16xf32>
    %134 = vector.shape_cast %133 : vector<16xf32> to vector<16x1xf32>
    %135 = tpu.reciprocal %134 {approx = true} : vector<16x1xf32> -> vector<16x1xf32>
    %136 = vector.broadcast %135 : vector<16x1xf32> to vector<16x16xf32>
    %137 = arith.mulf %132, %136 : vector<16x16xf32>
    %cst_62 = arith.constant dense<0.000000e+00> : vector<16x8xf32>
    %138 = tpu.matmul %137, %123, %cst_62 {dimension_numbers = #tpu.dot_dimension_numbers<[1], [0], [0], [1], [0, 0, 1, 1], [], []>} : vector<16x16xf32>, vector<16x8xf32>, vector<16x8xf32> -> vector<16x8xf32>
    %139 = arith.truncf %138 : vector<16x8xf32> to vector<16x8xbf16>
    %c2 = arith.constant 2 : index
    %c0_63 = arith.constant 0 : index
    %c0_64 = arith.constant 0 : index
    %140 = vector.load %arg16[%c2, %c0_63, %c0_64] : memref<4x8x32xbf16, #tpu.memory_space<vmem>>, vector<1x8x32xbf16>
    %141 = vector.shape_cast %140 : vector<1x8x32xbf16> to vector<8x32xbf16>
    %cst_65 = arith.constant dense<0.000000e+00> : vector<16x32xf32>
    %142 = tpu.matmul %139, %141, %cst_65 {dimension_numbers = #tpu.dot_dimension_numbers<[1], [0], [0], [1], [0, 0, 1, 1], [], []>} : vector<16x8xbf16>, vector<8x32xbf16>, vector<16x32xf32> -> vector<16x32xf32>
    %143 = arith.addf %120, %142 : vector<16x32xf32>
    %144 = vector.extract_strided_slice %49 {offsets = [0, 24], sizes = [16, 8], strides = [1, 1]} : vector<16x32xf32> to vector<16x8xf32>
    %145 = vector.extract_strided_slice %66 {offsets = [0, 24], sizes = [16, 8], strides = [1, 1]} : vector<16x32xf32> to vector<16x8xf32>
    %146 = vector.extract_strided_slice %73 {offsets = [0, 24], sizes = [16, 8], strides = [1, 1]} : vector<16x32xf32> to vector<16x8xf32>
    %cst_66 = arith.constant dense<0.000000e+00> : vector<16x16xf32>
    %147 = tpu.matmul %144, %145, %cst_66 {dimension_numbers = #tpu.dot_dimension_numbers<[1], [1], [0], [0], [0, 0, 1, 0], [], []>} : vector<16x8xf32>, vector<16x8xf32>, vector<16x16xf32> -> vector<16x16xf32>
    %cst_67 = arith.constant 0.353553385 : f32
    %148 = vector.broadcast %cst_67 : f32 to vector<16x16xf32>
    %149 = arith.mulf %147, %148 : vector<16x16xf32>
    %150 = arith.addf %149, %3 : vector<16x16xf32>
    %cst_68 = arith.constant dense<0xFF800000> : vector<16xf32>
    %151 = vector.multi_reduction <maximumf>, %150, %cst_68 [1] : vector<16x16xf32> to vector<16xf32>
    %152 = vector.shape_cast %151 : vector<16xf32> to vector<16x1xf32>
    %153 = vector.broadcast %152 : vector<16x1xf32> to vector<16x16xf32>
    %154 = arith.subf %150, %153 : vector<16x16xf32>
    %155 = math.exp %154 : vector<16x16xf32>
    %cst_69 = arith.constant dense<0.000000e+00> : vector<16xf32>
    %156 = vector.multi_reduction <add>, %155, %cst_69 [1] : vector<16x16xf32> to vector<16xf32>
    %157 = vector.shape_cast %156 : vector<16xf32> to vector<16x1xf32>
    %158 = tpu.reciprocal %157 {approx = true} : vector<16x1xf32> -> vector<16x1xf32>
    %159 = vector.broadcast %158 : vector<16x1xf32> to vector<16x16xf32>
    %160 = arith.mulf %155, %159 : vector<16x16xf32>
    %cst_70 = arith.constant dense<0.000000e+00> : vector<16x8xf32>
    %161 = tpu.matmul %160, %146, %cst_70 {dimension_numbers = #tpu.dot_dimension_numbers<[1], [0], [0], [1], [0, 0, 1, 1], [], []>} : vector<16x16xf32>, vector<16x8xf32>, vector<16x8xf32> -> vector<16x8xf32>
    %162 = arith.truncf %161 : vector<16x8xf32> to vector<16x8xbf16>
    %c3 = arith.constant 3 : index
    %c0_71 = arith.constant 0 : index
    %c0_72 = arith.constant 0 : index
    %163 = vector.load %arg16[%c3, %c0_71, %c0_72] : memref<4x8x32xbf16, #tpu.memory_space<vmem>>, vector<1x8x32xbf16>
    %164 = vector.shape_cast %163 : vector<1x8x32xbf16> to vector<8x32xbf16>
    %cst_73 = arith.constant dense<0.000000e+00> : vector<16x32xf32>
    %165 = tpu.matmul %162, %164, %cst_73 {dimension_numbers = #tpu.dot_dimension_numbers<[1], [0], [0], [1], [0, 0, 1, 1], [], []>} : vector<16x8xbf16>, vector<8x32xbf16>, vector<16x32xf32> -> vector<16x32xf32>
    %166 = arith.addf %143, %165 : vector<16x32xf32>
    %c0_74 = arith.constant 0 : index
    %c0_75 = arith.constant 0 : index
    %167 = vector.load %arg17[%c0_74, %c0_75] : memref<1x32xf32, #tpu.memory_space<vmem>>, vector<1x32xf32>
    %168 = vector.shape_cast %167 : vector<1x32xf32> to vector<32xf32>
    %169 = vector.shape_cast %168 : vector<32xf32> to vector<1x32xf32>
    %170 = vector.broadcast %169 : vector<1x32xf32> to vector<16x32xf32>
    %171 = arith.addf %166, %170 : vector<16x32xf32>
    %172 = arith.addf %0, %171 : vector<16x32xf32>
    %c0_76 = arith.constant 0 : index
    %c0_77 = arith.constant 0 : index
    %173 = vector.load %arg18[%c0_76, %c0_77] : memref<1x32xf32, #tpu.memory_space<vmem>>, vector<1x32xf32>
    %174 = vector.shape_cast %173 : vector<1x32xf32> to vector<32xf32>
    %c0_78 = arith.constant 0 : index
    %c0_79 = arith.constant 0 : index
    %175 = vector.load %arg19[%c0_78, %c0_79] : memref<1x32xf32, #tpu.memory_space<vmem>>, vector<1x32xf32>
    %176 = vector.shape_cast %175 : vector<1x32xf32> to vector<32xf32>
    %cst_80 = arith.constant dense<0.000000e+00> : vector<16xf32>
    %177 = vector.multi_reduction <add>, %172, %cst_80 [1] : vector<16x32xf32> to vector<16xf32>
    %178 = vector.shape_cast %177 : vector<16xf32> to vector<16x1xf32>
    %cst_81 = arith.constant 3.200000e+01 : f32
    %179 = vector.broadcast %cst_81 : f32 to vector<16x1xf32>
    %180 = arith.divf %178, %179 : vector<16x1xf32>
    %181 = vector.broadcast %180 : vector<16x1xf32> to vector<16x32xf32>
    %182 = arith.subf %172, %181 : vector<16x32xf32>
    %183 = arith.mulf %182, %182 : vector<16x32xf32>
    %cst_82 = arith.constant dense<0.000000e+00> : vector<16xf32>
    %184 = vector.multi_reduction <add>, %183, %cst_82 [1] : vector<16x32xf32> to vector<16xf32>
    %185 = vector.shape_cast %184 : vector<16xf32> to vector<16x1xf32>
    %cst_83 = arith.constant 3.200000e+01 : f32
    %186 = vector.broadcast %cst_83 : f32 to vector<16x1xf32>
    %187 = arith.divf %185, %186 : vector<16x1xf32>
    %188 = vector.broadcast %180 : vector<16x1xf32> to vector<16x32xf32>
    %189 = arith.subf %172, %188 : vector<16x32xf32>
    %cst_84 = arith.constant 9.99999974E-6 : f32
    %190 = vector.broadcast %cst_84 : f32 to vector<16x1xf32>
    %191 = arith.addf %187, %190 : vector<16x1xf32>
    %192 = math.rsqrt %191 : vector<16x1xf32>
    %193 = vector.broadcast %192 : vector<16x1xf32> to vector<16x32xf32>
    %194 = arith.mulf %189, %193 : vector<16x32xf32>
    %195 = vector.shape_cast %174 : vector<32xf32> to vector<1x32xf32>
    %196 = vector.broadcast %195 : vector<1x32xf32> to vector<16x32xf32>
    %197 = arith.mulf %194, %196 : vector<16x32xf32>
    %198 = vector.shape_cast %176 : vector<32xf32> to vector<1x32xf32>
    %199 = vector.broadcast %198 : vector<1x32xf32> to vector<16x32xf32>
    %200 = arith.addf %197, %199 : vector<16x32xf32>
    %201 = arith.truncf %200 : vector<16x32xf32> to vector<16x32xbf16>
    %c0_85 = arith.constant 0 : index
    %c0_86 = arith.constant 0 : index
    %202 = vector.load %arg20[%c0_85, %c0_86] : memref<32x64xbf16, #tpu.memory_space<vmem>>, vector<32x64xbf16>
    %cst_87 = arith.constant dense<0.000000e+00> : vector<16x64xf32>
    %203 = tpu.matmul %201, %202, %cst_87 {dimension_numbers = #tpu.dot_dimension_numbers<[1], [0], [0], [1], [0, 0, 1, 1], [], []>} : vector<16x32xbf16>, vector<32x64xbf16>, vector<16x64xf32> -> vector<16x64xf32>
    %c0_88 = arith.constant 0 : index
    %c0_89 = arith.constant 0 : index
    %204 = vector.load %arg21[%c0_88, %c0_89] : memref<1x64xf32, #tpu.memory_space<vmem>>, vector<1x64xf32>
    %205 = vector.shape_cast %204 : vector<1x64xf32> to vector<64xf32>
    %206 = vector.shape_cast %205 : vector<64xf32> to vector<1x64xf32>
    %207 = vector.broadcast %206 : vector<1x64xf32> to vector<16x64xf32>
    %208 = arith.addf %203, %207 : vector<16x64xf32>
    %cst_90 = arith.constant 5.000000e-01 : f32
    %209 = vector.broadcast %cst_90 : f32 to vector<16x64xf32>
    %210 = arith.mulf %209, %208 : vector<16x64xf32>
    %cst_91 = arith.constant 0.707106769 : f32
    %211 = vector.broadcast %cst_91 : f32 to vector<16x64xf32>
    %212 = arith.mulf %208, %211 : vector<16x64xf32>
    %213 = math.absf %212 : vector<16x64xf32>
    %cst_92 = arith.constant 0.327591091 : f32
    %214 = vector.broadcast %cst_92 : f32 to vector<16x64xf32>
    %215 = arith.mulf %214, %213 : vector<16x64xf32>
    %cst_93 = arith.constant 1.000000e+00 : f32
    %216 = vector.broadcast %cst_93 : f32 to vector<16x64xf32>
    %217 = arith.addf %216, %215 : vector<16x64xf32>
    %cst_94 = arith.constant 1.000000e+00 : f32
    %218 = vector.broadcast %cst_94 : f32 to vector<16x64xf32>
    %219 = arith.divf %218, %217 : vector<16x64xf32>
    %cst_95 = arith.constant 1.06140542 : f32
    %220 = vector.broadcast %cst_95 : f32 to vector<16x64xf32>
    %221 = arith.mulf %220, %219 : vector<16x64xf32>
    %cst_96 = arith.constant -1.45315206 : f32
    %222 = vector.broadcast %cst_96 : f32 to vector<16x64xf32>
    %223 = arith.addf %221, %222 : vector<16x64xf32>
    %224 = arith.mulf %223, %219 : vector<16x64xf32>
    %cst_97 = arith.constant 1.42141378 : f32
    %225 = vector.broadcast %cst_97 : f32 to vector<16x64xf32>
    %226 = arith.addf %224, %225 : vector<16x64xf32>
    %227 = arith.mulf %226, %219 : vector<16x64xf32>
    %cst_98 = arith.constant -0.284496725 : f32
    %228 = vector.broadcast %cst_98 : f32 to vector<16x64xf32>
    %229 = arith.addf %227, %228 : vector<16x64xf32>
    %230 = arith.mulf %229, %219 : vector<16x64xf32>
    %cst_99 = arith.constant 0.254829586 : f32
    %231 = vector.broadcast %cst_99 : f32 to vector<16x64xf32>
    %232 = arith.addf %230, %231 : vector<16x64xf32>
    %233 = arith.mulf %232, %219 : vector<16x64xf32>
    %cst_100 = arith.constant 0.000000e+00 : f32
    %234 = vector.broadcast %cst_100 : f32 to vector<16x64xf32>
    %235 = arith.subf %234, %213 : vector<16x64xf32>
    %236 = arith.mulf %235, %213 : vector<16x64xf32>
    %237 = math.exp %236 : vector<16x64xf32>
    %238 = arith.mulf %233, %237 : vector<16x64xf32>
    %cst_101 = arith.constant 1.000000e+00 : f32
    %239 = vector.broadcast %cst_101 : f32 to vector<16x64xf32>
    %240 = arith.subf %239, %238 : vector<16x64xf32>
    %cst_102 = arith.constant 0.000000e+00 : f32
    %241 = vector.broadcast %cst_102 : f32 to vector<16x64xf32>
    %242 = arith.cmpf oge, %212, %241 : vector<16x64xf32>
    %cst_103 = arith.constant 0.000000e+00 : f32
    %243 = vector.broadcast %cst_103 : f32 to vector<16x64xf32>
    %244 = arith.subf %243, %240 : vector<16x64xf32>
    %245 = arith.select %242, %240, %244 : vector<16x64xi1>, vector<16x64xf32>
    %cst_104 = arith.constant 1.000000e+00 : f32
    %246 = vector.broadcast %cst_104 : f32 to vector<16x64xf32>
    %247 = arith.addf %246, %245 : vector<16x64xf32>
    %248 = arith.mulf %210, %247 : vector<16x64xf32>
    %249 = arith.truncf %248 : vector<16x64xf32> to vector<16x64xbf16>
    %c0_105 = arith.constant 0 : index
    %c0_106 = arith.constant 0 : index
    %250 = vector.load %arg22[%c0_105, %c0_106] : memref<64x32xbf16, #tpu.memory_space<vmem>>, vector<64x32xbf16>
    %cst_107 = arith.constant dense<0.000000e+00> : vector<16x32xf32>
    %251 = tpu.matmul %249, %250, %cst_107 {dimension_numbers = #tpu.dot_dimension_numbers<[1], [0], [0], [1], [0, 0, 1, 1], [], []>} : vector<16x64xbf16>, vector<64x32xbf16>, vector<16x32xf32> -> vector<16x32xf32>
    %c0_108 = arith.constant 0 : index
    %c0_109 = arith.constant 0 : index
    %252 = vector.load %arg23[%c0_108, %c0_109] : memref<1x32xf32, #tpu.memory_space<vmem>>, vector<1x32xf32>
    %253 = vector.shape_cast %252 : vector<1x32xf32> to vector<32xf32>
    %254 = vector.shape_cast %253 : vector<32xf32> to vector<1x32xf32>
    %255 = vector.broadcast %254 : vector<1x32xf32> to vector<16x32xf32>
    %256 = arith.addf %251, %255 : vector<16x32xf32>
    %257 = arith.addf %172, %256 : vector<16x32xf32>
    %c0_110 = arith.constant 0 : index
    %c0_111 = arith.constant 0 : index
    %258 = vector.load %arg24[%c0_110, %c0_111] : memref<16x32xf32, #tpu.memory_space<vmem>>, vector<16x32xf32>
    tpu.vector_store %arg24[%c0_110, %c0_111], %257 {strides = array<i32>} : memref<16x32xf32, #tpu.memory_space<vmem>>, vector<16x32xf32>,
    return
  }
}

</mosaic_0001>

<bundles_post_ra>
// kernel: tpu_custom_call.1
= control target key start
LH: loop header
LB: loop body
LE: loop exit
PB: predicated region body
PF: predicated region fallthrough
CT: control target
= control target key end

     0   :  { %s3281_s0 = inlined_call_operand.vmem [shape: f32[16,32], index: 0, kind: input, shape index: {}]   ;;  %s3282_s1 = inlined_call_operand.vmem [shape: f32[16,32], index: 1, kind: input, shape index: {}]   ;;  %s3283_s2 = inlined_call_operand.vmem [shape: f32[16,32], index: 2, kind: input, shape index: {}]   ;;  %s3284_s3 = inlined_call_operand.hbm [shape: f32[16,16], index: 3, kind: input, shape index: {}]   ;;  %s3285_s4 = inlined_call_operand.hbm [shape: f32[1,32], index: 4, kind: input, shape index: {}]   ;;  %s3286_s5 = inlined_call_operand.hbm [shape: f32[1,32], index: 5, kind: input, shape index: {}]   ;;  %s3287_s6 = inlined_call_operand.hbm [shape: bf16[32,32], index: 6, kind: input, shape index: {}]   ;;  %s3288_s7 = inlined_call_operand.hbm [shape: bf16[32,32], index: 7, kind: input, shape index: {}]   ;;  %s3289_s8 = inlined_call_operand.hbm [shape: bf16[32,32], index: 8, kind: input, shape index: {}]   ;;  %s3290_s9 = inlined_call_operand.vmem [shape: bf16[32,32], index: 9, kind: input, shape index: {}]   ;;  %s3291_s10 = inlined_call_operand.hbm [shape: bf16[32,32], index: 10, kind: input, shape index: {}]   ;;  %s3292_s11 = inlined_call_operand.hbm [shape: f32[1,32], index: 11, kind: input, shape index: {}]   ;;  %s3293_s12 = inlined_call_operand.hbm [shape: f32[1,32], index: 12, kind: input, shape index: {}]   ;;  %s3294_s13 = inlined_call_operand.hbm [shape: f32[1,32], index: 13, kind: input, shape index: {}]   ;;  %s3295_s14 = inlined_call_operand.hbm [shape: f32[1,32], index: 14, kind: input, shape index: {}]   ;;  %s3296_s15 = inlined_call_operand.hbm [shape: f32[1,32], index: 15, kind: input, shape index: {}]   ;;  %s3297_s16 = inlined_call_operand.vmem [shape: bf16[4,8,32], index: 16, kind: input, shape index: {}]   ;;  %s3298_s17 = inlined_call_operand.hbm [shape: f32[1,32], index: 17, kind: input, shape index: {}]   ;;  %s3299_s18 = inlined_call_operand.vmem [shape: f32[1,32], index: 18, kind: input, shape index: {}]   ;;  %s3300_s19 = inlined_call_operand.vmem [shape: f32[1,32], index: 19, kind: input, shape index: {}]   ;;  %s3301_s20 = inlined_call_operand.vmem [shape: bf16[32,64], index: 20, kind: input, shape index: {}]   ;;  %s3302_s21 = inlined_call_operand.vmem [shape: f32[1,64], index: 21, kind: input, shape index: {}]   ;;  %s3303_s22 = inlined_call_operand.vmem [shape: bf16[64,32], index: 22, kind: input, shape index: {}]   ;;  %s3304_s23 = inlined_call_operand.vmem [shape: f32[1,32], index: 23, kind: input, shape index: {}]   ;;  %s3305_s24 = inlined_call_operand.hbm [shape: f32[16,32], index: 24, kind: output, shape index: {}]  }
   0x1   :  { %3316 = sst [smem:[#allocation32_spill]] %s3281_s0 }
   0x2   :  { %3317 = sst [smem:[#allocation33_spill]] %s3282_s1 }
   0x3   :  { %3318 = sst [smem:[#allocation34_spill]] %s3283_s2 }
   0x4   :  { %3319 = sst [smem:[#allocation35_spill]] %s3284_s3 }
   0x5   :  { %3320 = sst [smem:[#allocation36_spill]] %s3285_s4 }
   0x6   :  { %3321 = sst [smem:[#allocation37_spill]] %s3286_s5 }
   0x7   :  { %3322 = sst [smem:[#allocation38_spill]] %s3287_s6 }
   0x8   :  { %3323 = sst [smem:[#allocation39_spill]] %s3288_s7 }
   0x9   :  { %3324 = sst [smem:[#allocation40_spill]] %s3289_s8 }
   0xa   :  { %3325 = sst [smem:[#allocation41_spill]] %s3302_s21 }
   0xb   :  { %3326 = sst [smem:[#allocation42_spill]] %s3304_s23 }
   0xc   :  { %3327 = sst [smem:[#allocation43_spill]] %s3305_s24 }
   0xd   :  { %29 = vsyncpa [#allocation3], 0 }
   0xe   :  { %30 = vsyncpa [#allocation6], 0 }
   0xf   :  { %31 = vsyncpa [#allocation9], 0 }
  0x10   :  { %32 = vsyncpa [#allocation12], 0 }
  0x11   :  { %33 = vsyncpa [#allocation15], 0 }
  0x12   :  { %34 = vsyncpa [#allocation18], 0 }
  0x13   :  { %35 = vsyncpa [#allocation21], 0 }
  0x14   :  { %36 = vsyncpa [#allocation4], 0  ;;  %s2682_s5 = smov [#allocation5]   ;;  %s2683_s27 = smov [#allocation8]  }
  0x15   :  { %s61_s26 = sshll.u32 %s2682_s5, 4  ;;  %s80_s28 = sshll.u32 %s2683_s27, 4  ;;  %s62_s26 = int_to_ptr.vmem [resolvable:$true] %s61_s26  ;;  %s2830_s28 = int_to_ptr.vmem [resolvable:$true] %s80_s28 }
  0x16   :  { %s3328_s29 = sld [smem:[#allocation36_spill]] }
  0x1c   :  { %s2358_s0 = scalar_lea.hbm %s3328_s29, 16 }
  0x1d   :  { %p2359_p0 = scmp.ne.s32.totalorder %s3328_s29, %s2358_s0  ;;  %p2362_p1 = scmp.lt.u32.totalorder %s2358_s0, %s3328_s29 }
  0x1f   :  { %p2364_p2 = pnand %p2362_p1, %p2359_p0 }
  0x21   :  { %2367 = shalt.err (!%p2364_p2)
}
  0x22   :  { %s2368_s8 = scalar_lea.vmem %s62_s26, 16  ;;  %s2372_s4 = scalar_lea.vmem %s62_s26, 32 }
  0x23   :  { %p2369_p3 = scmp.ne.s32.totalorder %s62_s26, %s2368_s8  ;;  %p2373_p4 = scmp.lt.s32.totalorder %s62_s26, %s62_s26 }
  0x24   :  { %p2374_p5 = scmp.lt.s32.totalorder %s2372_s4, %s2368_s8 }
  0x26   :  { %p2375_p6 = por %p2374_p5, %p2373_p4 }
  0x28   :  { %p2376_p7 = pnand %p2375_p6, %p2369_p3 }
  0x2a   :  { %2379 = shalt.err (!%p2376_p7)
}
  0x2b   :  { %64 = dma.hbm_to_vmem [thread:$0]  %s3328_s29, 16, %s62_s26, [#allocation6]  }
  0x2c   :  { %s3329_s2 = sld [smem:[#allocation38_spill]] }
  0x32   :  { %s2380_s7 = scalar_lea.hbm %s3329_s2, 256 }
  0x33   :  { %p2381_p8 = scmp.ne.s32.totalorder %s3329_s2, %s2380_s7  ;;  %p2384_p9 = scmp.lt.u32.totalorder %s2380_s7, %s3329_s2 }
  0x35   :  { %p2386_p10 = pnand %p2384_p9, %p2381_p8 }
  0x37   :  { %2389 = shalt.err (!%p2386_p10)
}
  0x38   :  { %s2390_s8 = scalar_lea.vmem %s2830_s28, 256  ;;  %p2395_p12 = scmp.lt.s32.totalorder %s2830_s28, %s2830_s28 }
  0x39   :  { %p2391_p11 = scmp.ne.s32.totalorder %s2830_s28, %s2390_s8  ;;  %p2396_p13 = scmp.lt.s32.totalorder %s2390_s8, %s2390_s8 }
  0x3b   :  { %p2397_p0 = por %p2396_p13, %p2395_p12 }
  0x3d   :  { %p2398_p1 = pnand %p2397_p0, %p2391_p11 }
  0x3f   :  { %2401 = shalt.err (!%p2398_p1)
}
  0x40   :  { %s2684_s26 = smov 64   ;;  %s2685_s29 = smov 4  }
  0x41   :  { %86 = dma.hbm_to_vmem [thread:$0]  %s3329_s2, 256, %s2830_s28, [#allocation9], %s2684_s26, %s2684_s26, %s2685_s29  }
  0x42   :  { %s2686_s5 = smov [#allocation11]   ;;  %s2687_s6 = smov [#allocation14]  }
  0x43   :  { %s104_s27 = sshll.u32 %s2686_s5, 4  ;;  %s131_s7 = sshll.u32 %s2687_s6, 4  ;;  %s105_s27 = int_to_ptr.vmem [resolvable:$true] %s104_s27  ;;  %s132_s7 = int_to_ptr.vmem [resolvable:$true] %s131_s7 }
  0x44   :  { %s3330_s3 = sld [smem:[#allocation40_spill]] }
  0x4a   :  { %s2402_s25 = scalar_lea.hbm %s3330_s3, 256 }
  0x4b   :  { %p2403_p2 = scmp.ne.s32.totalorder %s3330_s3, %s2402_s25  ;;  %p2406_p3 = scmp.lt.u32.totalorder %s2402_s25, %s3330_s3 }
  0x4d   :  { %p2408_p4 = pnand %p2406_p3, %p2403_p2 }
  0x4f   :  { %2411 = shalt.err (!%p2408_p4)
}
  0x50   :  { %s2412_s28 = scalar_lea.vmem %s105_s27, 256  ;;  %p2417_p6 = scmp.lt.s32.totalorder %s105_s27, %s105_s27 }
  0x51   :  { %p2413_p5 = scmp.ne.s32.totalorder %s105_s27, %s2412_s28  ;;  %p2418_p7 = scmp.lt.s32.totalorder %s2412_s28, %s2412_s28 }
  0x53   :  { %p2419_p8 = por %p2418_p7, %p2417_p6 }
  0x55   :  { %p2420_p9 = pnand %p2419_p8, %p2413_p5 }
  0x57   :  { %2423 = shalt.err (!%p2420_p9)
}
  0x58   :  { %110 = dma.hbm_to_vmem [thread:$0]  %s3330_s3, 256, %s105_s27, [#allocation12], %s2684_s26, %s2684_s26, %s2685_s29  }
  0x59   :  { %s2424_s21 = scalar_lea.hbm %s3292_s11, 16 }
  0x5a   :  { %p2425_p10 = scmp.ne.s32.totalorder %s3292_s11, %s2424_s21  ;;  %p2428_p11 = scmp.lt.u32.totalorder %s2424_s21, %s3292_s11 }
  0x5c   :  { %p2430_p12 = pnand %p2428_p11, %p2425_p10 }
  0x5e   :  { %2433 = shalt.err (!%p2430_p12)
}
  0x5f   :  { %s2434_s0 = scalar_lea.vmem %s132_s7, 16  ;;  %s2438_s25 = scalar_lea.vmem %s132_s7, 32 }
  0x60   :  { %p2435_p13 = scmp.ne.s32.totalorder %s132_s7, %s2434_s0  ;;  %p2439_p0 = scmp.lt.s32.totalorder %s132_s7, %s132_s7 }
  0x61   :  { %p2440_p1 = scmp.lt.s32.totalorder %s2438_s25, %s2434_s0 }
  0x63   :  { %p2441_p2 = por %p2440_p1, %p2439_p0 }
  0x65   :  { %p2442_p3 = pnand %p2441_p2, %p2435_p13 }
  0x67   :  { %2445 = shalt.err (!%p2442_p3)
}
  0x68   :  { %134 = dma.hbm_to_vmem [thread:$0]  %s3292_s11, 16, %s132_s7, [#allocation15]  }
  0x69   :  { %s2688_s8 = smov [#allocation17]   ;;  %s2689_s2 = smov [#allocation20]  }
  0x6a   :  { %s151_s28 = sshll.u32 %s2688_s8, 4  ;;  %s171_s4 = sshll.u32 %s2689_s2, 4  ;;  %s152_s28 = int_to_ptr.vmem [resolvable:$true] %s151_s28  ;;  %s172_s4 = int_to_ptr.vmem [resolvable:$true] %s171_s4 }
  0x6b   :  { %s2446_s21 = scalar_lea.hbm %s3294_s13, 16 }
  0x6c   :  { %p2447_p4 = scmp.ne.s32.totalorder %s3294_s13, %s2446_s21  ;;  %p2450_p5 = scmp.lt.u32.totalorder %s2446_s21, %s3294_s13 }
  0x6e   :  { %p2452_p6 = pnand %p2450_p5, %p2447_p4 }
  0x70   :  { %2455 = shalt.err (!%p2452_p6)
}
  0x71   :  { %s2456_s11 = scalar_lea.vmem %s152_s28, 16  ;;  %s2460_s7 = scalar_lea.vmem %s152_s28, 32 }
  0x72   :  { %p2457_p7 = scmp.ne.s32.totalorder %s152_s28, %s2456_s11  ;;  %p2461_p8 = scmp.lt.s32.totalorder %s152_s28, %s152_s28 }
  0x73   :  { %p2462_p9 = scmp.lt.s32.totalorder %s2460_s7, %s2456_s11 }
  0x75   :  { %p2463_p10 = por %p2462_p9, %p2461_p8 }
  0x77   :  { %p2464_p11 = pnand %p2463_p10, %p2457_p7 }
  0x79   :  { %2467 = shalt.err (!%p2464_p11)
}
  0x7a   :  { %154 = dma.hbm_to_vmem [thread:$0]  %s3294_s13, 16, %s152_s28, [#allocation18]  }
  0x7b   :  { %s2468_s8 = scalar_lea.hbm %s3296_s15, 16 }
  0x7c   :  { %p2469_p12 = scmp.ne.s32.totalorder %s3296_s15, %s2468_s8  ;;  %p2472_p13 = scmp.lt.u32.totalorder %s2468_s8, %s3296_s15 }
  0x7e   :  { %p2474_p0 = pnand %p2472_p13, %p2469_p12 }
  0x80   :  { %2477 = shalt.err (!%p2474_p0)
}
  0x81   :  { %s2478_s23 = scalar_lea.vmem %s172_s4, 16  ;;  %s2482_s5 = scalar_lea.vmem %s172_s4, 32 }
  0x82   :  { %p2479_p1 = scmp.ne.s32.totalorder %s172_s4, %s2478_s23  ;;  %p2483_p2 = scmp.lt.s32.totalorder %s172_s4, %s172_s4 }
  0x83   :  { %p2484_p3 = scmp.lt.s32.totalorder %s2482_s5, %s2478_s23 }
  0x85   :  { %p2485_p4 = por %p2484_p3, %p2483_p2 }
  0x87   :  { %p2486_p5 = pnand %p2485_p4, %p2479_p1 }
  0x89   :  { %2489 = shalt.err (!%p2486_p5)
}
  0x8a   :  { %174 = dma.hbm_to_vmem [thread:$0]  %s3296_s15, 16, %s172_s4, [#allocation21]  }
  0x8b   :  { %s2690_s6 = smov [#allocation2]   ;;  %s3331_s0 = sld [smem:[#allocation35_spill]] }
  0x8c   :  { %s48_s30 = sshll.u32 %s2690_s6, 4  ;;  %s49_s30 = int_to_ptr.vmem [resolvable:$true] %s48_s30 }
  0x91   :  { %s2490_s25 = scalar_lea.hbm %s3331_s0, 256 }
  0x92   :  { %p2491_p6 = scmp.ne.s32.totalorder %s3331_s0, %s2490_s25  ;;  %p2494_p7 = scmp.lt.u32.totalorder %s2490_s25, %s3331_s0 }
  0x94   :  { %p2496_p8 = pnand %p2494_p7, %p2491_p6 }
  0x96   :  { %2499 = shalt.err (!%p2496_p8)
}
  0x97   :  { %s2500_s24 = scalar_lea.vmem %s49_s30, 256  ;;  %p2505_p10 = scmp.lt.s32.totalorder %s49_s30, %s49_s30 }
  0x98   :  { %p2501_p9 = scmp.ne.s32.totalorder %s49_s30, %s2500_s24  ;;  %p2506_p11 = scmp.lt.s32.totalorder %s2500_s24, %s2500_s24 }
  0x9a   :  { %p2507_p12 = por %p2506_p11, %p2505_p10 }
  0x9c   :  { %p2508_p13 = pnand %p2507_p12, %p2501_p9 }
  0x9e   :  { %2511 = shalt.err (!%p2508_p13)
}
  0x9f   :  { %s2691_s15 = smov 128   ;;  %s2692_s4 = smov 8  }
  0xa0   :  { %54 = dma.hbm_to_vmem [thread:$0]  %s3331_s0, 256, %s49_s30, [#allocation3], %s2691_s15, %s2691_s15, %s2692_s4  }
  0xa1   :  { %s2693_s23 = smov [#allocation7]   ;;  %s2694_s13 = smov [#allocation10]  }
  0xa2   :  { %s71_s5 = sshll.u32 %s2693_s23, 4  ;;  %s92_s28 = sshll.u32 %s2694_s13, 4  ;;  %s72_s5 = int_to_ptr.vmem [resolvable:$true] %s71_s5  ;;  %s93_s28 = int_to_ptr.vmem [resolvable:$true] %s92_s28 }
  0xa3   :  { %s3332_s7 = sld [smem:[#allocation37_spill]] }
  0xa9   :  { %s2512_s25 = scalar_lea.hbm %s3332_s7, 16 }
  0xaa   :  { %p2513_p0 = scmp.ne.s32.totalorder %s3332_s7, %s2512_s25  ;;  %p2516_p1 = scmp.lt.u32.totalorder %s2512_s25, %s3332_s7 }
  0xac   :  { %p2518_p2 = pnand %p2516_p1, %p2513_p0 }
  0xae   :  { %2521 = shalt.err (!%p2518_p2)
}
  0xaf   :  { %s2522_s30 = scalar_lea.vmem %s72_s5, 16  ;;  %s2526_s0 = scalar_lea.vmem %s72_s5, 32 }
  0xb0   :  { %p2523_p3 = scmp.ne.s32.totalorder %s72_s5, %s2522_s30  ;;  %p2527_p4 = scmp.lt.s32.totalorder %s72_s5, %s72_s5 }
  0xb1   :  { %p2528_p5 = scmp.lt.s32.totalorder %s2526_s0, %s2522_s30 }
  0xb3   :  { %p2529_p6 = por %p2528_p5, %p2527_p4 }
  0xb5   :  { %p2530_p7 = pnand %p2529_p6, %p2523_p3 }
  0xb7   :  { %2533 = shalt.err (!%p2530_p7)
}
  0xb8   :  { %74 = dma.hbm_to_vmem [thread:$0]  %s3332_s7, 16, %s72_s5, [#allocation6]  }
  0xb9   :  { %s3333_s13 = sld [smem:[#allocation39_spill]] }
  0xbf   :  { %s2534_s6 = scalar_lea.hbm %s3333_s13, 256 }
  0xc0   :  { %p2535_p8 = scmp.ne.s32.totalorder %s3333_s13, %s2534_s6  ;;  %p2538_p9 = scmp.lt.u32.totalorder %s2534_s6, %s3333_s13 }
  0xc2   :  { %p2540_p10 = pnand %p2538_p9, %p2535_p8 }
  0xc4   :  { %2543 = shalt.err (!%p2540_p10)
}
  0xc5   :  { %s2544_s8 = scalar_lea.vmem %s93_s28, 256  ;;  %p2549_p12 = scmp.lt.s32.totalorder %s93_s28, %s93_s28 }
  0xc6   :  { %p2545_p11 = scmp.ne.s32.totalorder %s93_s28, %s2544_s8  ;;  %p2550_p13 = scmp.lt.s32.totalorder %s2544_s8, %s2544_s8 }
  0xc8   :  { %p2551_p0 = por %p2550_p13, %p2549_p12 }
  0xca   :  { %p2552_p1 = pnand %p2551_p0, %p2545_p11 }
  0xcc   :  { %2555 = shalt.err (!%p2552_p1)
}
  0xcd   :  { %98 = dma.hbm_to_vmem [thread:$0]  %s3333_s13, 256, %s93_s28, [#allocation9], %s2684_s26, %s2684_s26, %s2685_s29  }
  0xce   :  { %s2695_s2 = smov [#allocation13]   ;;  %s2696_s0 = smov [#allocation16]  }
  0xcf   :  { %s118_s30 = sshll.u32 %s2695_s2, 4  ;;  %s141_s24 = sshll.u32 %s2696_s0, 4  ;;  %s119_s30 = int_to_ptr.vmem [resolvable:$true] %s118_s30  ;;  %s142_s24 = int_to_ptr.vmem [resolvable:$true] %s141_s24 }
  0xd0   :  { %s2556_s23 = scalar_lea.hbm %s3291_s10, 256 }
  0xd1   :  { %p2557_p2 = scmp.ne.s32.totalorder %s3291_s10, %s2556_s23  ;;  %p2560_p3 = scmp.lt.u32.totalorder %s2556_s23, %s3291_s10 }
  0xd3   :  { %p2562_p4 = pnand %p2560_p3, %p2557_p2 }
  0xd5   :  { %2565 = shalt.err (!%p2562_p4)
}
  0xd6   :  { %s2566_s28 = scalar_lea.vmem %s119_s30, 256  ;;  %p2571_p6 = scmp.lt.s32.totalorder %s119_s30, %s119_s30 }
  0xd7   :  { %p2567_p5 = scmp.ne.s32.totalorder %s119_s30, %s2566_s28  ;;  %p2572_p7 = scmp.lt.s32.totalorder %s2566_s28, %s2566_s28 }
  0xd9   :  { %p2573_p8 = por %p2572_p7, %p2571_p6 }
  0xdb   :  { %p2574_p9 = pnand %p2573_p8, %p2567_p5 }
  0xdd   :  { %2577 = shalt.err (!%p2574_p9)
}
  0xde   :  { %124 = dma.hbm_to_vmem [thread:$0]  %s3291_s10, 256, %s119_s30, [#allocation12], %s2684_s26, %s2684_s26, %s2685_s29  }
  0xdf   :  { %s2578_s7 = scalar_lea.hbm %s3293_s12, 16 }
  0xe0   :  { %p2579_p10 = scmp.ne.s32.totalorder %s3293_s12, %s2578_s7  ;;  %p2582_p11 = scmp.lt.u32.totalorder %s2578_s7, %s3293_s12 }
  0xe2   :  { %p2584_p12 = pnand %p2582_p11, %p2579_p10 }
  0xe4   :  { %2587 = shalt.err (!%p2584_p12)
}
  0xe5   :  { %s2588_s23 = scalar_lea.vmem %s142_s24, 16  ;;  %s2592_s6 = scalar_lea.vmem %s142_s24, 32 }
  0xe6   :  { %p2589_p13 = scmp.ne.s32.totalorder %s142_s24, %s2588_s23  ;;  %p2593_p0 = scmp.lt.s32.totalorder %s142_s24, %s142_s24 }
  0xe7   :  { %p2594_p1 = scmp.lt.s32.totalorder %s2592_s6, %s2588_s23 }
  0xe9   :  { %p2595_p2 = por %p2594_p1, %p2593_p0 }
  0xeb   :  { %p2596_p3 = pnand %p2595_p2, %p2589_p13 }
  0xed   :  { %2599 = shalt.err (!%p2596_p3)
}
  0xee   :  { %144 = dma.hbm_to_vmem [thread:$0]  %s3293_s12, 16, %s142_s24, [#allocation15]  }
  0xef   :  { %s2697_s29 = smov [#allocation19]   ;;  %s2698_s11 = smov [#allocation22]  }
  0xf0   :  { %s161_s30 = sshll.u32 %s2697_s29, 4  ;;  %s183_s25 = sshll.u32 %s2698_s11, 4  ;;  %s162_s30 = int_to_ptr.vmem [resolvable:$true] %s161_s30  ;;  %s184_s25 = int_to_ptr.vmem [resolvable:$true] %s183_s25 }
  0xf1   :  { %s2600_s13 = scalar_lea.hbm %s3295_s14, 16 }
  0xf2   :  { %p2601_p4 = scmp.ne.s32.totalorder %s3295_s14, %s2600_s13  ;;  %p2604_p5 = scmp.lt.u32.totalorder %s2600_s13, %s3295_s14 }
  0xf4   :  { %p2606_p6 = pnand %p2604_p5, %p2601_p4 }
  0xf6   :  { %2609 = shalt.err (!%p2606_p6)
}
  0xf7   :  { %s2610_s12 = scalar_lea.vmem %s162_s30, 16  ;;  %s2614_s24 = scalar_lea.vmem %s162_s30, 32 }
  0xf8   :  { %p2611_p7 = scmp.ne.s32.totalorder %s162_s30, %s2610_s12  ;;  %p2615_p8 = scmp.lt.s32.totalorder %s162_s30, %s162_s30 }
  0xf9   :  { %p2616_p9 = scmp.lt.s32.totalorder %s2614_s24, %s2610_s12 }
  0xfb   :  { %p2617_p10 = por %p2616_p9, %p2615_p8 }
  0xfd   :  { %p2618_p11 = pnand %p2617_p10, %p2611_p7 }
  0xff   :  { %2621 = shalt.err (!%p2618_p11)
}
 0x100   :  { %164 = dma.hbm_to_vmem [thread:$0]  %s3295_s14, 16, %s162_s30, [#allocation18]  }
 0x101   :  { %s2622_s23 = scalar_lea.hbm %s3298_s17, 16 }
 0x102   :  { %p2623_p12 = scmp.ne.s32.totalorder %s3298_s17, %s2622_s23  ;;  %p2626_p13 = scmp.lt.u32.totalorder %s2622_s23, %s3298_s17 }
 0x104   :  { %p2628_p0 = pnand %p2626_p13, %p2623_p12 }
 0x106   :  { %2631 = shalt.err (!%p2628_p0)
}
 0x107   :  { %s2632_s11 = scalar_lea.vmem %s184_s25, 16  ;;  %s2636_s27 = scalar_lea.vmem %s184_s25, 32 }
 0x108   :  { %p2633_p1 = scmp.ne.s32.totalorder %s184_s25, %s2632_s11  ;;  %p2637_p2 = scmp.lt.s32.totalorder %s184_s25, %s184_s25 }
 0x109   :  { %p2638_p3 = scmp.lt.s32.totalorder %s2636_s27, %s2632_s11 }
 0x10b   :  { %p2639_p4 = por %p2638_p3, %p2637_p2 }
 0x10d   :  { %p2640_p5 = pnand %p2639_p4, %p2633_p1 }
 0x10f   :  { %2643 = shalt.err (!%p2640_p5)
}
 0x110   :  { %186 = dma.hbm_to_vmem [thread:$0]  %s3298_s17, 16, %s184_s25, [#allocation21]  }
 0x111   :  { %2666 = dma.done.wait [#allocation3], 256  }
 0x112   :  { %2667 = vsyncadd [#allocation3], 4294967040 }
 0x113   :  { %2668 = dma.done.wait [#allocation6], 32  }
 0x114   :  { %2669 = vsyncadd [#allocation6], 4294967264 }
 0x115   :  { %2670 = dma.done.wait [#allocation9], 512  }
 0x116   :  { %2671 = vsyncadd [#allocation9], 4294966784 }
 0x117   :  { %2672 = dma.done.wait [#allocation12], 512  }
 0x118   :  { %2673 = vsyncadd [#allocation12], 4294966784 }
 0x119   :  { %2674 = dma.done.wait [#allocation15], 32  }
 0x11a   :  { %2675 = vsyncadd [#allocation15], 4294967264 }
 0x11b   :  { %2676 = dma.done.wait [#allocation18], 32  }
 0x11c   :  { %2677 = vsyncadd [#allocation18], 4294967264 }
 0x11d   :  { %2678 = dma.done.wait [#allocation21], 32  }
 0x11e   :  { %2679 = vsyncadd [#allocation21], 4294967264  ;;  %vm249_vm0 = vcmask 261120   ;;  %s3334_s3 = sld [smem:[#allocation32_spill]]  ;;  %v2294_v14 = vld [vmem:[#allocation8] sm:$0xff]   ;;  %v2295_v15 = vld [vmem:[#allocation10] sm:$0xff]  }
 0x11f   :  { %v2699_v16 = vmov 0.0   ;;  %v2296_v17 = vld [vmem:[#allocation8 + $0x8] sm:$0xff]   ;;  %v2297_v18 = vld [vmem:[#allocation10 + $0x8] sm:$0xff]   ;;  %vm2700_vm1 = vmmov 0   ;;  %v2298_v35 = vld [vmem:[#allocation11] sm:$0xff]   ;;  %s3335_s2 = sld [smem:[#allocation33_spill]] }
 0x120   :  { %2061 = vmatprep.subr.bf16.mxu0 %v2699_v16  ;;  %2069 = vmatprep.subr.bf16.mxu1 %v2699_v16  ;;  %v1932_v27 = vld [vmem:[#allocation5] ss:$0 sm:$0xff]  ;;  %v1933_v31 = vld [vmem:[#allocation7] ss:$0 sm:$0xff]  ;;  %v2299_v36 = vld [vmem:[%s3290_s9] sm:$0xff]   ;;  %s3336_s21 = sld [smem:[#allocation34_spill]] }
 0x121   :  { %2062 = vmatpush3.bf16.msra.mxu0 %v2294_v14  ;;  %2070 = vmatpush3.bf16.msra.mxu1 %v2295_v15  ;;  %v2300_v38 = vld [vmem:[#allocation11 + $0x8] sm:$0xff]   ;;  %v2301_v39 = vld [vmem:[%s3290_s9 + $0x8] sm:$0xff]   ;;  %v1934_v42 = vld [vmem:[#allocation14] ss:$0 sm:$0xff]  ;;  %vm629_vm2 = vcmask 64512   ;;  %s2701_s29 = smov 120  }
 0x122   :  { %2063 = vmatprep.subr.bf16.mxu0 %v2699_v16  ;;  %2071 = vmatprep.subr.bf16.mxu1 %v2699_v16  ;;  %v2302_v40 = vld [vmem:[#allocation13] sm:$0xff]   ;;  %v2303_v41 = vld [vmem:[#allocation13 + $0x8] sm:$0xff]   ;;  %v1938_v43 = vld [vmem:[#allocation16] ss:$0 sm:$0xff]  ;;  %vm721_vm4 = vcmask 130048   ;;  %s2702_s11 = smov 112  }
 0x123   :  { %2065 = vmatprep.mubr.msk.bf16.mxu0 %vm2700_vm1, %v2699_v16  ;;  %2073 = vmatprep.mubr.msk.bf16.mxu1 %vm2700_vm1, %v2699_v16  ;;  %vm3081_vm3 = vmpackc.low %vm629_vm2, %vm629_vm2  ;;  %vm1039_vm5 = vcmask 1043456   ;;  %s2703_s13 = smov 104   ;;  %vm1860_vm8 = vcmask 523264   ;;  %s3340_s14 = sld [smem:[#allocation42_spill]] }
 0x124   :  { %v3011_v0 = vld [vmem:[%s3334_s3] sm:$0xff]  ;;  %v3016_v1 = vld [vmem:[%s3334_s3 + $0x8] sm:$0xff]  ;;  %s2704_s30 = smov [#allocation23]  }
 0x125   :  { %v250_v2 = vsel %vm249_vm0, %v3011_v0, 0.0  ;;  %v253_v3 = vsel %vm249_vm0, %v3016_v1, 0.0  ;;  %2064 = vmatpush3.bf16.msra.mxu0 %v2296_v17  ;;  %2072 = vmatpush3.bf16.msra.mxu1 %v2297_v18  ;;  %v241_v44 = vld [vmem:[%s3335_s2] sm:$0xff]  ;;  %v242_v52 = vld [vmem:[%s3335_s2 + $0x8] sm:$0xff]  ;;  %s1914_s28 = sshll.u32 %s2704_s30, 4  ;;  %s1915_s28 = int_to_ptr.vmem [resolvable:$true] %s1914_s28 }
 0x126   :  { %251 = vadd.xlane.f32.xlu0 %v250_v2  ;;  %2077 = vmatprep.subr.bf16.mxu0 %v2699_v16  ;;  %v243_v46 = vld [vmem:[%s3336_s21] sm:$0xff]  ;;  %v244_v54 = vld [vmem:[%s3336_s21 + $0x8] sm:$0xff]  ;;  %p2649_p7 = scmp.lt.s32.totalorder %s1915_s28, %s1915_s28 }
 0x127   :  { %2085 = vmatprep.subr.bf16.mxu1 %v2699_v16 }
 0x12a   :  { %254 = vadd.xlane.f32.xlu0 %v253_v3  ;;  %v1942_v3 = vld [vmem:[#allocation17] ss:$0 sm:$0xff] }
 0x1b3   :  { %v252_v4 = vpop.xlane.xlu0 %251 }
 0x1b4   :  { %v257_v5 = vmul.f32 0.03125, %v252_v4  ;;  %v1946_v4 = vld [vmem:[#allocation19] ss:$0 sm:$0xff] }
 0x1b6   :  { %v259_v6 = vsub.f32 %v3011_v0, %v257_v5 }
 0x1b7   :  { %v255_v7 = vpop.xlane.xlu0 %254 }
 0x1b8   :  { %v258_v8 = vmul.f32 0.03125, %v255_v7  ;;  %v261_v9 = vmul.f32 %v259_v6, %v259_v6 }
 0x1ba   :  { %v260_v10 = vsub.f32 %v3016_v1, %v258_v8  ;;  %v263_v11 = vsel %vm249_vm0, %v261_v9, 0.0 }
 0x1bb   :  { %264 = vadd.xlane.f32.xlu1 %v263_v11 }
 0x1bc   :  { %v262_v12 = vmul.f32 %v260_v10, %v260_v10 }
 0x1be   :  { %v266_v13 = vsel %vm249_vm0, %v262_v12, 0.0 }
 0x1bf   :  { %267 = vadd.xlane.f32.xlu1 %v266_v13 }
 0x248   :  { %v265_v19 = vpop.xlane.xlu1 %264 }
 0x249   :  { %v269_v20 = vmul.f32 0.03125, %v265_v19 }
 0x24b   :  { %v271_v21 = vadd.f32 1e-05, %v269_v20 }
 0x24c   :  { %v268_v22 = vpop.xlane.xlu1 %267 }
 0x24d   :  { %2310 = vrsqrt.f32 %v271_v21  ;;  %v270_v23 = vmul.f32 0.03125, %v268_v22 }
 0x24f   :  { %v272_v24 = vadd.f32 1e-05, %v270_v23 }
 0x251   :  { %2312 = vrsqrt.f32 %v272_v24 }
 0x257   :  { %v2311_v25 = vpop.eup %2310 }
 0x258   :  { %v275_v26 = vmul.f32 %v2311_v25, %v259_v6  ;;  %v1950_v25 = vld [vmem:[#allocation20] ss:$0 sm:$0xff] }
 0x25a   :  { %v283_v29 = vmul.f32 %v1932_v27, %v275_v26 }
 0x25b   :  { %v2313_v28 = vpop.eup %2312 }
 0x25c   :  { %v276_v30 = vmul.f32 %v2313_v28, %v260_v10  ;;  %v291_v33 = vadd.f32 %v1933_v31, %v283_v29 }
 0x25e   :  { %v284_v32 = vmul.f32 %v1932_v27, %v276_v30 }
 0x260   :  { %v292_v34 = vadd.f32 %v1933_v31, %v284_v32 }
 0x262   :  { %v293_v37 = vpack.c.bf16 %v292_v34, %v291_v33 }
 0x264   :  { %2066 = vmatmul.mubr.msk.bf16.vlgmr.msra.gmra.mrb[0].mxu0 %vm249_vm0, %v293_v37  ;;  %2074 = vmatmul.mubr.msk.bf16.vlgmr.msra.gmra.mrb[0].mxu1 %vm249_vm0, %v293_v37 }
 0x265   :  { %2078 = vmatpush3.bf16.msra.mxu0 %v2298_v35  ;;  %2086 = vmatpush3.bf16.msra.mxu1 %v2299_v36 }
 0x266   :  { %2079 = vmatprep.subr.bf16.mxu0 %v2699_v16  ;;  %2087 = vmatprep.subr.bf16.mxu1 %v2699_v16 }
 0x267   :  { %2081 = vmatprep.mubr.msk.bf16.mxu0 %vm2700_vm1, %v2699_v16  ;;  %2089 = vmatprep.mubr.msk.bf16.mxu1 %vm2700_vm1, %v2699_v16 }
 0x269   :  { %2080 = vmatpush3.bf16.msra.mxu0 %v2300_v38  ;;  %2088 = vmatpush3.bf16.msra.mxu1 %v2301_v39 }
 0x26a   :  { %2093 = vmatprep.subr.bf16.mxu0 %v2699_v16 }
 0x26c   :  { %2082 = vmatmul.mubr.msk.bf16.vlgmr.msra.gmra.mrb[4].mxu0 %vm249_vm0, %v293_v37  ;;  %2090 = vmatmul.mubr.msk.bf16.vlgmr.msra.gmra.mrb[4].mxu1 %vm249_vm0, %v293_v37 }
 0x26d   :  { %2094 = vmatpush3.bf16.msra.mxu0 %v2302_v40  ;;  %2097 = vmatprep.mubr.msk.bf16.mxu0 %vm2700_vm1, %v2699_v16 }
 0x26e   :  { %2095 = vmatprep.subr.bf16.mxu0 %v2699_v16 }
 0x271   :  { %2096 = vmatpush3.bf16.msra.mxu0 %v2303_v41 }
 0x274   :  { %2098 = vmatmul.mubr.msk.bf16.vlgmr.msra.gmra.mrb[8].mxu0 %vm249_vm0, %v293_v37 }
 0x337   :  { %v354_v45 = vpop.f32.mrb[0].mxu0  ;;  %v420_v47 = vpop.f32.mrb[0].mxu1 }
 0x338   :  { %v355_v48 = vadd.f32 %v1934_v42, %v354_v45  ;;  %v421_v49 = vadd.f32 %v1938_v43, %v420_v47  ;;  %v2067_v50 = vpop.f32.mrb[1].mxu0  ;;  %v2075_v51 = vpop.f32.mrb[1].mxu1 }
 0x339   :  { %v357_v53 = vpop.f32.mrb[2].mxu0  ;;  %v423_v55 = vpop.f32.mrb[2].mxu1  ;;  %v3107_v51 = vld [vmem:[#allocation2] sm:$0xff] }
 0x33a   :  { %v361_v56 = vmul.f32 %v355_v48, %v241_v44  ;;  %v427_v57 = vmul.f32 %v421_v49, %v243_v46  ;;  %v358_v58 = vadd.f32 %v1934_v42, %v357_v53  ;;  %v424_v59 = vadd.f32 %v1938_v43, %v423_v55  ;;  %v2068_v60 = vpop.f32.mrb[3].mxu0  ;;  %v2076_v61 = vpop.f32.mrb[3].mxu1  ;;  %v3104_v49 = vld [vmem:[#allocation2 + $0x8] sm:$0xff] }
 0x33c   :  { %v3069_v62 = vadd.f32 %v427_v57, %v361_v56  ;;  %v362_v63 = vmul.f32 %v358_v58, %v242_v52  ;;  %v428_v2 = vmul.f32 %v424_v59, %v244_v54 }
 0x33e   :  { %v3071_v5 = vadd.f32 %v428_v2, %v362_v63  ;;  %827 = vrot.lane.b32.xlu1 %v3069_v62, %s2701_s29  ;;  %2105 = vmatprep.mubr.msk.f32.mxu1 %vm629_vm2, %v3069_v62 }
 0x33f   :  { %v488_v6 = vpop.f32.mrb[4].mxu0  ;;  %v554_v7 = vpop.f32.mrb[4].mxu1 }
 0x340   :  { %v489_v8 = vadd.f32 %v1942_v3, %v488_v6  ;;  %v555_v9 = vadd.f32 %v1946_v4, %v554_v7  ;;  %v2083_v10 = vpop.f32.mrb[5].mxu0  ;;  %v2091_v11 = vpop.f32.mrb[5].mxu1 }
 0x341   :  { %v491_v12 = vpop.f32.mrb[6].mxu0  ;;  %v557_v13 = vpop.f32.mrb[6].mxu1 }
 0x342   :  { %v495_v14 = vmul.f32 %v489_v8, %v241_v44  ;;  %v561_v15 = vmul.f32 %v555_v9, %v243_v46  ;;  %v492_v17 = vadd.f32 %v1942_v3, %v491_v12  ;;  %v558_v18 = vadd.f32 %v1946_v4, %v557_v13  ;;  %v2092_v19 = vpop.f32.mrb[7].mxu1  ;;  %829 = vrot.lane.b32.xlu1 %v3071_v5, %s2701_s29  ;;  %v2084_v20 = vpop.f32.mrb[7].mxu0 }
 0x344   :  { %v563_v21 = vadd.f32 %v561_v15, %v495_v14  ;;  %v496_v22 = vmul.f32 %v492_v17, %v242_v52  ;;  %v562_v23 = vmul.f32 %v558_v18, %v244_v54 }
 0x346   :  { %v564_v24 = vadd.f32 %v562_v23, %v496_v22 }
 0x347   :  { %v622_v26 = vpop.f32.mrb[8].mxu0 }
 0x348   :  { %v2099_v28 = vpop.f32.mrb[9].mxu0  ;;  %v3085_v29 = vpack.i.bf16 %v564_v24, %v563_v21  ;;  %v2201_v30 = vpack.c.bf16 %v564_v24, %v563_v21  ;;  %v623_v32 = vadd.f32 %v1950_v25, %v622_v26 }
 0x349   :  { %v625_v31 = vpop.f32.mrb[10].mxu0 }
 0x34a   :  { %v626_v33 = vadd.f32 %v1950_v25, %v625_v31  ;;  %2265 = vrot.lane.b32.xlu0 %v3085_v29, %s2701_s29  ;;  %v2100_v34 = vpop.f32.mrb[11].mxu0  ;;  %2203 = vmatprep.subr.msk.bf16.mxu1 %vm3081_vm3, %v2201_v30 }
 0x34b   :  { %2206 = vmatpush3.bf16.xpose.msk.msra.mxu1 %vm3081_vm3, %v2201_v30  ;;  %v1966_v30 = vld [vmem:[%s3297_s16 + $0x4] sm:$0xf] }
 0x34c   :  { %v2207_v35 = vpack.c.bf16 %v626_v33, %v623_v32  ;;  %v3093_v36 = vpack.i.bf16 %v626_v33, %v623_v32 }
 0x34e   :  { %2208 = vmatprep.subr.bf16.mxu1 %v2207_v35 }
 0x352   :  { %2106 = vmatmul.mubr.msk.f32.vlgmr.msra.gmra.mrb[8].mxu1 %vm629_vm2, %v3071_v5 }
 0x353   :  { %2210 = vmatpush3.bf16.msra.mxu1 %v2207_v35  ;;  %v1041_v35 = vsel %vm1039_vm5, %v1966_v30, 0 }
 0x354   :  { %2135 = vmatprep.subr.bf16.mxu1 %v2699_v16 }
 0x3b0   :  { %v828_v37 = vpop.permute.xlu1 %827 }
 0x3b1   :  { %2119 = vmatprep.mubr.msk.f32.mxu0 %vm629_vm2, %v828_v37 }
 0x3b4   :  { %v830_v42 = vpop.permute.xlu1 %829 }
 0x3bc   :  { %v2266_v38 = vpop.permute.xlu0 %2265 }
 0x3bd   :  { %v2268_v39 = vunpack.i.h.bf16 %v2266_v38  ;;  %v2267_v40 = vunpack.i.l.bf16 %v2266_v38 }
 0x3bf   :  { %v2211_v41 = vpack.c.bf16 %v2268_v39, %v2267_v40 }
 0x3c1   :  { %2213 = vmatprep.subr.msk.bf16.mxu0 %vm3081_vm3, %v2211_v41 }
 0x3c2   :  { %2216 = vmatpush3.bf16.xpose.msk.msra.mxu0 %vm3081_vm3, %v2211_v41 }
 0x3c9   :  { %2120 = vmatmul.mubr.msk.f32.vlgmr.msra.gmra.mrb[12].mxu0 %vm629_vm2, %v830_v42 }
 0x425   :  { %v2107_v43 = vpop.f32.mrb[8].mxu1 }
 0x426   :  { %v708_v44 = vpop.f32.mrb[9].mxu1  ;;  %v718_v18 = vmul.f32 0.35355338, %v2107_v43 }
 0x427   :  { %v717_v55 = vmul.f32 0.35355338, %v708_v44 }
 0x428   :  { %v720_v19 = vadd.f32 %v718_v18, %v3104_v49 }
 0x429   :  { %v719_v56 = vadd.f32 %v717_v55, %v3107_v51 }
 0x42a   :  { %v725_v20 = vsel %vm721_vm4, %v720_v19, -inf }
 0x42b   :  { %v722_v57 = vsel %vm721_vm4, %v719_v56, -inf }
 0x49c   :  { %v2121_v45 = vpop.f32.mrb[12].mxu0 }
 0x49d   :  { %v919_v46 = vmul.f32 0.35355338, %v2121_v45  ;;  %v909_v47 = vpop.f32.mrb[13].mxu0 }
 0x49e   :  { %v918_v48 = vmul.f32 0.35355338, %v909_v47 }
 0x49f   :  { %v921_v50 = vadd.f32 %v919_v46, %v3104_v49 }
 0x4a0   :  { %v920_v52 = vadd.f32 %v918_v48, %v3107_v51 }
 0x4a1   :  { %v925_v53 = vsel %vm721_vm4, %v921_v50, -inf }
 0x4a2   :  { %926 = vmax.xlane.f32.xlu0 %v925_v53  ;;  %v922_v54 = vsel %vm721_vm4, %v920_v52, -inf }
 0x4a3   :  { %923 = vmax.xlane.f32.xlu1 %v922_v54  ;;  %v826_v54 = vld [vmem:[%s3297_s16] sm:$0xf] }
 0x4a4   :  { %v1088_v55 = vsel %vm1039_vm5, %v826_v54, 0 }
 0x4b4   :  { %2270 = vrot.lane.b32.xlu1 %v3093_v36, %s2701_s29 }
 0x4b8   :  { %1131 = vrot.lane.b32.xlu1 %v3069_v62, %s2702_s11 }
 0x4bc   :  { %1133 = vrot.lane.b32.xlu1 %v3071_v5, %s2702_s11 }
 0x4e0   :  { %723 = vmax.xlane.f32.xlu1 %v722_v57 }
 0x52f   :  { %v927_v58 = vpop.xlane.xlu0 %926 }
 0x530   :  { %v929_v59 = vsub.f32 %v921_v50, %v927_v58  ;;  %v924_v60 = vpop.xlane.xlu1 %923 }
 0x531   :  { %v928_v61 = vsub.f32 %v920_v52, %v924_v60 }
 0x532   :  { %v932_v63 = vmul.f32 1.442695, %v929_v59 }
 0x533   :  { %v930_v2 = vmul.f32 1.442695, %v928_v61 }
 0x534   :  { %v2271_v3 = vpop.permute.xlu1 %2270 }
 0x535   :  { %2314 = vpow2.f32 %v930_v2  ;;  %v2273_v4 = vunpack.i.h.bf16 %v2271_v3  ;;  %v2272_v6 = vunpack.i.l.bf16 %v2271_v3 }
 0x536   :  { %2316 = vpow2.f32 %v932_v63 }
 0x537   :  { %v2217_v7 = vpack.c.bf16 %v2273_v4, %v2272_v6 }
 0x538   :  { %v1132_v12 = vpop.permute.xlu1 %1131 }
 0x539   :  { %2218 = vmatprep.subr.bf16.mxu0 %v2217_v7 }
 0x53a   :  { %2220 = vmatpush3.bf16.msra.mxu0 %v2217_v7 }
 0x53b   :  { %2129 = vmatprep.subr.bf16.mxu0 %v2699_v16 }
 0x53c   :  { %v1134_v13 = vpop.permute.xlu1 %1133 }
 0x53f   :  { %v2315_v8 = vpop.eup %2314 }
 0x540   :  { %v934_v9 = vsel %vm721_vm4, %v2315_v8, 0.0  ;;  %v2317_v10 = vpop.eup %2316 }
 0x541   :  { %935 = vadd.xlane.f32.xlu0 %v934_v9  ;;  %v937_v11 = vsel %vm721_vm4, %v2317_v10, 0.0 }
 0x545   :  { %938 = vadd.xlane.f32.xlu0 %v937_v11 }
 0x55b   :  { %2275 = vrot.lane.b32.xlu0 %v3085_v29, %s2702_s11 }
 0x56d   :  { %v724_v14 = vpop.xlane.xlu1 %723 }
 0x56e   :  { %v728_v15 = vsub.f32 %v719_v56, %v724_v14 }
 0x570   :  { %v730_v17 = vmul.f32 1.442695, %v728_v15 }
 0x572   :  { %2318 = vpow2.f32 %v730_v17 }
 0x57a   :  { %726 = vmax.xlane.f32.xlu0 %v725_v20 }
 0x57c   :  { %v2319_v21 = vpop.eup %2318 }
 0x57d   :  { %v734_v22 = vsel %vm721_vm4, %v2319_v21, 0.0 }
 0x57e   :  { %735 = vadd.xlane.f32.xlu0 %v734_v22 }
 0x5ce   :  { %v936_v23 = vpop.xlane.xlu0 %935 }
 0x5cf   :  { %2320 = vrcp.f32 %v936_v23 }
 0x5d2   :  { %v939_v24 = vpop.xlane.xlu0 %938 }
 0x5d3   :  { %2322 = vrcp.f32 %v939_v24 }
 0x5d6   :  { %v2276_v26 = vpop.permute.xlu0 %2275 }
 0x5d7   :  { %v2278_v31 = vunpack.i.h.bf16 %v2276_v26  ;;  %v2277_v32 = vunpack.i.l.bf16 %v2276_v26 }
 0x5d9   :  { %v2321_v25 = vpop.eup %2320  ;;  %v2221_v37 = vpack.c.bf16 %v2278_v31, %v2277_v32 }
 0x5da   :  { %v942_v28 = vmul.f32 %v2321_v25, %v2315_v8 }
 0x5dc   :  { %2126 = vmatprep.mubr.msk.f32.mxu0 %vm721_vm4, %v942_v28 }
 0x5dd   :  { %v2323_v33 = vpop.eup %2322 }
 0x5de   :  { %v943_v34 = vmul.f32 %v2323_v33, %v2317_v10 }
 0x5e0   :  { %2127 = vmatmul.mubr.msk.f32.vlgmr.msra.gmra.mrb[14].mxu0 %vm721_vm4, %v943_v34 }
 0x5e1   :  { %2130 = vmatpush3.bf16.msra.mxu0 %v1041_v35  ;;  %2131 = vmatprep.mubr.msk.bf16.mxu0 %vm2700_vm1, %v2699_v16 }
 0x5e2   :  { %2223 = vmatprep.subr.msk.bf16.mxu0 %vm3081_vm3, %v2221_v37 }
 0x607   :  { %v727_v38 = vpop.xlane.xlu0 %726 }
 0x608   :  { %v729_v39 = vsub.f32 %v720_v19, %v727_v38 }
 0x60a   :  { %v732_v40 = vmul.f32 1.442695, %v729_v39 }
 0x60b   :  { %v736_v41 = vpop.xlane.xlu0 %735 }
 0x60c   :  { %2324 = vpow2.f32 %v732_v40 }
 0x60d   :  { %2326 = vrcp.f32 %v736_v41 }
 0x616   :  { %v2325_v42 = vpop.eup %2324 }
 0x617   :  { %v2327_v43 = vpop.eup %2326  ;;  %v737_v44 = vsel %vm721_vm4, %v2325_v42, 0.0 }
 0x618   :  { %738 = vadd.xlane.f32.xlu0 %v737_v44  ;;  %v742_v45 = vmul.f32 %v2327_v43, %v2319_v21  ;;  %v1975_v44 = vld [vmem:[%s3297_s16 + $0x8] sm:$0xf] }
 0x61a   :  { %2112 = vmatprep.mubr.msk.f32.mxu1 %vm721_vm4, %v742_v45  ;;  %v1342_v45 = vsel %vm1039_vm5, %v1975_v44, 0 }
 0x6a5   :  { %v739_v46 = vpop.xlane.xlu0 %738 }
 0x6a6   :  { %2328 = vrcp.f32 %v739_v46 }
 0x6b0   :  { %v2329_v47 = vpop.eup %2328 }
 0x6b1   :  { %v743_v48 = vmul.f32 %v2329_v47, %v2325_v42 }
 0x6b3   :  { %2113 = vmatmul.mubr.msk.f32.vlgmr.msra.gmra.mrb[10].mxu1 %vm721_vm4, %v743_v48  ;;  %v2128_v50 = vpop.f32.mrb[14].mxu0 }
 0x6b4   :  { %v1024_v52 = vpop.f32.mrb[15].mxu0  ;;  %2137 = vmatprep.mubr.msk.bf16.mxu1 %vm2700_vm1, %v2699_v16  ;;  %2136 = vmatpush3.bf16.msra.mxu1 %v1088_v55 }
 0x6b5   :  { %v1033_v53 = vpack.c.bf16 %v2128_v50, %v1024_v52 }
 0x6b7   :  { %2132 = vmatmul.mubr.msk.bf16.vlgmr.msra.gmra.mrb[16].mxu0 %vm629_vm2, %v1033_v53 }
 0x6b8   :  { %2226 = vmatpush3.bf16.xpose.msk.msra.mxu0 %vm3081_vm3, %v2221_v37  ;;  %2145 = vmatprep.mubr.msk.f32.mxu0 %vm629_vm2, %v1132_v12 }
 0x6b9   :  { %2155 = vmatprep.subr.bf16.mxu0 %v2699_v16 }
 0x6bf   :  { %2146 = vmatmul.mubr.msk.f32.vlgmr.msra.gmra.mrb[20].mxu0 %vm629_vm2, %v1134_v13 }
 0x6c0   :  { %2157 = vmatprep.mubr.msk.bf16.mxu0 %vm2700_vm1, %v2699_v16  ;;  %2156 = vmatpush3.bf16.msra.mxu0 %v1342_v45 }
 0x786   :  { %v2114_v56 = vpop.f32.mrb[10].mxu1 }
 0x787   :  { %v816_v57 = vpop.f32.mrb[11].mxu1 }
 0x788   :  { %v825_v58 = vpack.c.bf16 %v2114_v56, %v816_v57 }
 0x78a   :  { %v1077_v59 = vpop.f32.mrb[16].mxu0  ;;  %2138 = vmatmul.mubr.msk.bf16.vlgmr.msra.gmra.mrb[12].mxu1 %vm629_vm2, %v825_v58 }
 0x78b   :  { %v2133_v60 = vpop.f32.mrb[17].mxu0 }
 0x78c   :  { %v1080_v61 = vpop.f32.mrb[18].mxu0 }
 0x78d   :  { %v2134_v63 = vpop.f32.mrb[19].mxu0 }
 0x792   :  { %v2147_v2 = vpop.f32.mrb[20].mxu0 }
 0x793   :  { %v1223_v3 = vmul.f32 0.35355338, %v2147_v2  ;;  %v1213_v4 = vpop.f32.mrb[21].mxu0 }
 0x794   :  { %v1222_v6 = vmul.f32 0.35355338, %v1213_v4 }
 0x795   :  { %v1225_v7 = vadd.f32 %v1223_v3, %v3104_v49 }
 0x796   :  { %v1224_v8 = vadd.f32 %v1222_v6, %v3107_v51 }
 0x797   :  { %v1229_v9 = vsel %vm721_vm4, %v1225_v7, -inf }
 0x798   :  { %1230 = vmax.xlane.f32.xlu0 %v1229_v9  ;;  %v1226_v10 = vsel %vm721_vm4, %v1224_v8, -inf }
 0x799   :  { %1227 = vmax.xlane.f32.xlu1 %v1226_v10 }
 0x7aa   :  { %2280 = vrot.lane.b32.xlu1 %v3093_v36, %s2702_s11  ;;  %s3339_s11 = sld [smem:[#allocation41_spill]] }
 0x7ae   :  { %1387 = vrot.lane.b32.xlu1 %v3069_v62, %s2703_s13 }
 0x825   :  { %v1231_v11 = vpop.xlane.xlu0 %1230 }
 0x826   :  { %v1233_v12 = vsub.f32 %v1225_v7, %v1231_v11  ;;  %v1228_v13 = vpop.xlane.xlu1 %1227 }
 0x827   :  { %v1232_v14 = vsub.f32 %v1224_v8, %v1228_v13 }
 0x828   :  { %v1236_v15 = vmul.f32 1.442695, %v1233_v12 }
 0x829   :  { %v1234_v17 = vmul.f32 1.442695, %v1232_v14 }
 0x82a   :  { %2330 = vpow2.f32 %v1236_v15  ;;  %v2281_v18 = vpop.permute.xlu1 %2280 }
 0x82b   :  { %2332 = vpow2.f32 %v1234_v17  ;;  %v2283_v19 = vunpack.i.h.bf16 %v2281_v18  ;;  %v2282_v20 = vunpack.i.l.bf16 %v2281_v18 }
 0x82d   :  { %v2227_v21 = vpack.c.bf16 %v2283_v19, %v2282_v20 }
 0x82e   :  { %v1388_v33 = vpop.permute.xlu1 %1387 }
 0x82f   :  { %2228 = vmatprep.subr.bf16.mxu1 %v2227_v21 }
 0x830   :  { %2230 = vmatpush3.bf16.msra.mxu1 %v2227_v21 }
 0x834   :  { %v2331_v22 = vpop.eup %2330 }
 0x835   :  { %v2333_v23 = vpop.eup %2332  ;;  %v1241_v24 = vsel %vm721_vm4, %v2331_v22, 0.0 }
 0x836   :  { %1242 = vadd.xlane.f32.xlu0 %v1241_v24  ;;  %v1238_v62 = vsel %vm721_vm4, %v2333_v23, 0.0 }
 0x837   :  { %1239 = vadd.xlane.f32.xlu1 %v1238_v62 }
 0x848   :  { %1389 = vrot.lane.b32.xlu1 %v3071_v5, %s2703_s13 }
 0x84c   :  { %2285 = vrot.lane.b32.xlu0 %v3085_v29, %s2703_s13 }
 0x85d   :  { %v1124_v25 = vpop.f32.mrb[12].mxu1 }
 0x85e   :  { %v3170_v26 = vadd.f32 %v1124_v25, %v1077_v59  ;;  %v2139_v28 = vpop.f32.mrb[13].mxu1 }
 0x85f   :  { %v1127_v30 = vpop.f32.mrb[14].mxu1  ;;  %v1985_v28 = vld [vmem:[#allocation22] ss:$0 sm:$0xff] }
 0x860   :  { %v3172_v31 = vadd.f32 %v1127_v30, %v1080_v61  ;;  %v2140_v32 = vpop.f32.mrb[15].mxu1 }
 0x8c3   :  { %v1243_v34 = vpop.xlane.xlu0 %1242 }
 0x8c4   :  { %2334 = vrcp.f32 %v1243_v34  ;;  %v1240_v35 = vpop.xlane.xlu1 %1239 }
 0x8c5   :  { %2336 = vrcp.f32 %v1240_v35 }
 0x8c7   :  { %v2286_v37 = vpop.permute.xlu0 %2285 }
 0x8c8   :  { %v2288_v38 = vunpack.i.h.bf16 %v2286_v37  ;;  %v2287_v39 = vunpack.i.l.bf16 %v2286_v37  ;;  %v1390_v43 = vpop.permute.xlu1 %1389 }
 0x8ca   :  { %v2231_v5 = vpack.c.bf16 %v2288_v38, %v2287_v39 }
 0x8cc   :  { %2233 = vmatprep.subr.msk.bf16.mxu1 %vm3081_vm3, %v2231_v5 }
 0x8ce   :  { %v2335_v29 = vpop.eup %2334 }
 0x8cf   :  { %v2337_v40 = vpop.eup %2336  ;;  %v1247_v42 = vmul.f32 %v2335_v29, %v2331_v22  ;;  %v1983_v22 = vld [vmem:[%s3297_s16 + $0xc] sm:$0xf] }
 0x8d0   :  { %v1246_v41 = vmul.f32 %v2337_v40, %v2333_v23  ;;  %v1598_v23 = vsel %vm1039_vm5, %v1983_v22, 0 }
 0x8d2   :  { %2152 = vmatprep.mubr.msk.f32.mxu1 %vm721_vm4, %v1246_v41 }
 0x8d3   :  { %2153 = vmatmul.mubr.msk.f32.vlgmr.msra.gmra.mrb[16].mxu1 %vm721_vm4, %v1247_v42 }
 0x8d4   :  { %2236 = vmatpush3.bf16.xpose.msk.msra.mxu1 %vm3081_vm3, %v2231_v5  ;;  %2165 = vmatprep.mubr.msk.f32.mxu1 %vm629_vm2, %v1388_v33 }
 0x8d5   :  { %2175 = vmatprep.subr.bf16.mxu1 %v2699_v16 }
 0x8db   :  { %2166 = vmatmul.mubr.msk.f32.vlgmr.msra.gmra.mrb[18].mxu1 %vm629_vm2, %v1390_v43 }
 0x8dc   :  { %2177 = vmatprep.mubr.msk.bf16.mxu1 %vm2700_vm1, %v2699_v16  ;;  %2176 = vmatpush3.bf16.msra.mxu1 %v1598_v23 }
 0x8dd   :  { %2189 = vmatprep.subr.bf16.mxu1 %v2699_v16 }
 0x9a6   :  { %v2154_v46 = vpop.f32.mrb[16].mxu1 }
 0x9a7   :  { %v1326_v27 = vpop.f32.mrb[17].mxu1 }
 0x9a8   :  { %v1335_v47 = vpack.c.bf16 %v2154_v46, %v1326_v27 }
 0x9aa   :  { %2158 = vmatmul.mubr.msk.bf16.vlgmr.msra.gmra.mrb[24].mxu0 %vm629_vm2, %v1335_v47  ;;  %v2304_v47 = vld [vmem:[%s3301_s20] sm:$0xff]  }
 0x9ae   :  { %v2167_v48 = vpop.f32.mrb[18].mxu1 }
 0x9af   :  { %v1479_v50 = vmul.f32 0.35355338, %v2167_v48  ;;  %v1469_v52 = vpop.f32.mrb[19].mxu1  ;;  %v2305_v48 = vld [vmem:[%s3301_s20 + $0x8] sm:$0xff]  }
 0x9b0   :  { %v1478_v53 = vmul.f32 0.35355338, %v1469_v52 }
 0x9b1   :  { %v1481_v54 = vadd.f32 %v1479_v50, %v3104_v49 }
 0x9b2   :  { %v1480_v55 = vadd.f32 %v1478_v53, %v3107_v51 }
 0x9b3   :  { %v1485_v56 = vsel %vm721_vm4, %v1481_v54, -inf }
 0x9b4   :  { %1486 = vmax.xlane.f32.xlu0 %v1485_v56  ;;  %v1482_v57 = vsel %vm721_vm4, %v1480_v55, -inf }
 0x9b5   :  { %1483 = vmax.xlane.f32.xlu1 %v1482_v57 }
 0x9c6   :  { %2290 = vrot.lane.b32.xlu1 %v3093_v36, %s2703_s13  ;;  %s2644_s13 = scalar_lea.vmem %s1915_s28, 256 }
 0x9c7   :  { %p2645_p6 = scmp.ne.s32.totalorder %s1915_s28, %s2644_s13  ;;  %p2650_p8 = scmp.lt.s32.totalorder %s2644_s13, %s2644_s13 }
 0x9c9   :  { %p2651_p9 = por %p2650_p8, %p2649_p7 }
 0x9cb   :  { %p2652_p10 = pnand %p2651_p9, %p2645_p6 }
 0xa41   :  { %v1487_v58 = vpop.xlane.xlu0 %1486 }
 0xa42   :  { %v1489_v59 = vsub.f32 %v1481_v54, %v1487_v58  ;;  %v1484_v60 = vpop.xlane.xlu1 %1483 }
 0xa43   :  { %v1488_v61 = vsub.f32 %v1480_v55, %v1484_v60 }
 0xa44   :  { %v1492_v63 = vmul.f32 1.442695, %v1489_v59  ;;  %v1986_v59 = vld [vmem:[%s3299_s18] ss:$0 sm:$0xff] }
 0xa45   :  { %v1490_v2 = vmul.f32 1.442695, %v1488_v61 }
 0xa46   :  { %v2291_v3 = vpop.permute.xlu1 %2290 }
 0xa47   :  { %2338 = vpow2.f32 %v1490_v2  ;;  %v2293_v49 = vunpack.i.h.bf16 %v2291_v3  ;;  %v2292_v4 = vunpack.i.l.bf16 %v2291_v3  ;;  %v1987_v2 = vld [vmem:[%s3300_s19] ss:$0 sm:$0xff] }
 0xa48   :  { %2340 = vpow2.f32 %v1492_v63 }
 0xa49   :  { %v2237_v51 = vpack.c.bf16 %v2293_v49, %v2292_v4 }
 0xa4b   :  { %2238 = vmatprep.subr.bf16.mxu0 %v2237_v51 }
 0xa4c   :  { %2240 = vmatpush3.bf16.msra.mxu0 %v2237_v51 }
 0xa4d   :  { %2181 = vmatprep.subr.bf16.mxu0 %v2699_v16 }
 0xa51   :  { %v2339_v6 = vpop.eup %2338 }
 0xa52   :  { %v1494_v7 = vsel %vm721_vm4, %v2339_v6, 0.0  ;;  %v2341_v36 = vpop.eup %2340 }
 0xa53   :  { %1495 = vadd.xlane.f32.xlu0 %v1494_v7  ;;  %v1497_v8 = vsel %vm721_vm4, %v2341_v36, 0.0  ;;  %v2307_v7 = vld [vmem:[%s3303_s22 + $0x8] sm:$0xff]  }
 0xa57   :  { %1498 = vadd.xlane.f32.xlu0 %v1497_v8  ;;  %v2309_v8 = vld [vmem:[%s3303_s22 + $0x18] sm:$0xff]  }
 0xa7d   :  { %v1378_v9 = vpop.f32.mrb[24].mxu0 }
 0xa7e   :  { %v1385_v10 = vadd.f32 %v1378_v9, %v3170_v26  ;;  %v2159_v11 = vpop.f32.mrb[25].mxu0  ;;  %v1988_v9 = vld [vmem:[%s3339_s11] ss:$0 sm:$0xff] }
 0xa7f   :  { %v1381_v12 = vpop.f32.mrb[26].mxu0 }
 0xa80   :  { %v1386_v13 = vadd.f32 %v1381_v12, %v3172_v31  ;;  %v2160_v14 = vpop.f32.mrb[27].mxu0 }
 0xae0   :  { %v1496_v15 = vpop.xlane.xlu0 %1495 }
 0xae1   :  { %2342 = vrcp.f32 %v1496_v15 }
 0xae4   :  { %v1499_v17 = vpop.xlane.xlu0 %1498 }
 0xae5   :  { %2344 = vrcp.f32 %v1499_v17 }
 0xaeb   :  { %v2343_v18 = vpop.eup %2342 }
 0xaec   :  { %v1502_v19 = vmul.f32 %v2343_v18, %v2339_v6  ;;  %v2306_v6 = vld [vmem:[%s3303_s22] sm:$0xff]  }
 0xaee   :  { %2172 = vmatprep.mubr.msk.f32.mxu0 %vm721_vm4, %v1502_v19 }
 0xaef   :  { %v2345_v20 = vpop.eup %2344 }
 0xaf0   :  { %v1503_v21 = vmul.f32 %v2345_v20, %v2341_v36  ;;  %v2308_v36 = vld [vmem:[%s3303_s22 + $0x10] sm:$0xff]  }
 0xaf2   :  { %2173 = vmatmul.mubr.msk.f32.vlgmr.msra.gmra.mrb[22].mxu0 %vm721_vm4, %v1503_v21 }
 0xaf3   :  { %2185 = vmatprep.mubr.msk.bf16.mxu0 %vm2700_vm1, %v2699_v16  ;;  %2182 = vmatpush3.bf16.msra.mxu0 %v2304_v47 }
 0xaf4   :  { %2183 = vmatprep.subr.bf16.mxu0 %v2699_v16 }
 0xaf7   :  { %2184 = vmatpush3.bf16.msra.mxu0 %v2305_v48 }
 0xbc5   :  { %v2174_v24 = vpop.f32.mrb[22].mxu0 }
 0xbc6   :  { %v1582_v62 = vpop.f32.mrb[23].mxu0 }
 0xbc7   :  { %v1591_v25 = vpack.c.bf16 %v2174_v24, %v1582_v62 }
 0xbc9   :  { %2178 = vmatmul.mubr.msk.bf16.vlgmr.msra.gmra.mrb[20].mxu1 %vm629_vm2, %v1591_v25 }
 0xbca   :  { %2197 = vmatprep.mubr.msk.bf16.mxu1 %vm2700_vm1, %v2699_v16  ;;  %2190 = vmatpush3.bf16.msra.mxu1 %v2306_v6  ;;  %v1992_v6 = vld [vmem:[%s3340_s14] ss:$0 sm:$0xff] }
 0xbcb   :  { %2191 = vmatprep.subr.bf16.mxu1 %v2699_v16 }
 0xbce   :  { %2192 = vmatpush3.bf16.msra.mxu1 %v2307_v7 }
 0xbcf   :  { %2193 = vmatprep.subr.bf16.mxu1 %v2699_v16 }
 0xbd2   :  { %2194 = vmatpush3.bf16.msra.mxu1 %v2308_v36 }
 0xbd3   :  { %2195 = vmatprep.subr.bf16.mxu1 %v2699_v16 }
 0xbd6   :  { %2196 = vmatpush3.bf16.msra.mxu1 %v2309_v8 }
 0xc9c   :  { %v1634_v26 = vpop.f32.mrb[20].mxu1 }
 0xc9d   :  { %v1641_v30 = vadd.f32 %v1634_v26, %v1385_v10  ;;  %v2179_v31 = vpop.f32.mrb[21].mxu1 }
 0xc9e   :  { %v1637_v32 = vpop.f32.mrb[22].mxu1 }
 0xc9f   :  { %v1650_v33 = vadd.f32 %v1985_v28, %v1641_v30  ;;  %v1642_v34 = vadd.f32 %v1637_v32, %v1386_v13  ;;  %v2180_v35 = vpop.f32.mrb[23].mxu1 }
 0xca1   :  { %v3214_v37 = vadd.f32 %v1650_v33, %v3011_v0  ;;  %v1651_v38 = vadd.f32 %v1985_v28, %v1642_v34 }
 0xca3   :  { %v3217_v39 = vadd.f32 %v1651_v38, %v3016_v1  ;;  %v1656_v5 = vsel %vm249_vm0, %v3214_v37, 0.0 }
 0xca4   :  { %1657 = vadd.xlane.f32.xlu0 %v1656_v5 }
 0xca5   :  { %v1659_v29 = vsel %vm249_vm0, %v3217_v39, 0.0 }
 0xca8   :  { %1660 = vadd.xlane.f32.xlu0 %v1659_v29 }
 0xd31   :  { %v1658_v40 = vpop.xlane.xlu0 %1657 }
 0xd32   :  { %v1662_v41 = vmul.f32 0.03125, %v1658_v40 }
 0xd34   :  { %v1664_v42 = vsub.f32 %v3214_v37, %v1662_v41 }
 0xd35   :  { %v1661_v43 = vpop.xlane.xlu0 %1660 }
 0xd36   :  { %v1663_v44 = vmul.f32 0.03125, %v1661_v43  ;;  %v1666_v0 = vmul.f32 %v1664_v42, %v1664_v42 }
 0xd38   :  { %v1665_v45 = vsub.f32 %v3217_v39, %v1663_v44  ;;  %v1668_v1 = vsel %vm249_vm0, %v1666_v0, 0.0 }
 0xd39   :  { %1669 = vadd.xlane.f32.xlu0 %v1668_v1 }
 0xd3a   :  { %v1667_v46 = vmul.f32 %v1665_v45, %v1665_v45 }
 0xd3c   :  { %v1671_v27 = vsel %vm249_vm0, %v1667_v46, 0.0 }
 0xd3d   :  { %1672 = vadd.xlane.f32.xlu0 %v1671_v27 }
 0xdc6   :  { %v1670_v50 = vpop.xlane.xlu0 %1669 }
 0xdc7   :  { %v1674_v52 = vmul.f32 0.03125, %v1670_v50 }
 0xdc9   :  { %v1676_v53 = vadd.f32 1e-05, %v1674_v52 }
 0xdca   :  { %v1673_v54 = vpop.xlane.xlu0 %1672 }
 0xdcb   :  { %2346 = vrsqrt.f32 %v1676_v53  ;;  %v1675_v55 = vmul.f32 0.03125, %v1673_v54 }
 0xdcd   :  { %v1677_v56 = vadd.f32 1e-05, %v1675_v55 }
 0xdcf   :  { %2348 = vrsqrt.f32 %v1677_v56 }
 0xdd5   :  { %v2347_v57 = vpop.eup %2346 }
 0xdd6   :  { %v1680_v58 = vmul.f32 %v2347_v57, %v1664_v42 }
 0xdd8   :  { %v1688_v61 = vmul.f32 %v1986_v59, %v1680_v58 }
 0xdd9   :  { %v2349_v60 = vpop.eup %2348 }
 0xdda   :  { %v1681_v63 = vmul.f32 %v2349_v60, %v1665_v45  ;;  %v1696_v49 = vadd.f32 %v1987_v2, %v1688_v61 }
 0xddc   :  { %v1689_v3 = vmul.f32 %v1986_v59, %v1681_v63 }
 0xdde   :  { %v1697_v4 = vadd.f32 %v1987_v2, %v1689_v3 }
 0xde0   :  { %v1698_v51 = vpack.c.bf16 %v1697_v4, %v1696_v49 }
 0xde2   :  { %2186 = vmatmul.mubr.msk.bf16.vlgmr.msra.gmra.mrb[28].mxu0 %vm249_vm0, %v1698_v51 }
 0xeb5   :  { %v1759_v10 = vpop.f32.mrb[28].mxu0 }
 0xeb6   :  { %v1760_v11 = vadd.f32 %v1988_v9, %v1759_v10  ;;  %v2187_v12 = vpop.f32.mrb[29].mxu0 }
 0xeb7   :  { %v1762_v13 = vpop.f32.mrb[30].mxu0 }
 0xeb8   :  { %v1768_v14 = vmul.f32 0.70710677, %v1760_v11  ;;  %v1763_v15 = vadd.f32 %v1988_v9, %v1762_v13  ;;  %v2188_v17 = vpop.f32.mrb[31].mxu0  ;;  %v1766_v63 = vmul.f32 0.5, %v1760_v11 }
 0xeba   :  { %v1770_v18 = vand.u32 2147483647, %v1768_v14  ;;  %v1769_v19 = vmul.f32 0.70710677, %v1763_v15  ;;  %vm1810_vm6 = vcmp.ge.f32.partialorder %v1768_v14, 0.0  ;;  %v1767_v2 = vmul.f32 0.5, %v1763_v15 }
 0xebc   :  { %v1772_v20 = vmul.f32 0.3275911, %v1770_v18  ;;  %v1771_v16 = vand.u32 2147483647, %v1769_v19  ;;  %v1798_v24 = vsub.f32 0.0, %v1770_v18  ;;  %vm1811_vm7 = vcmp.ge.f32.partialorder %v1769_v19, 0.0 }
 0xebe   :  { %v1774_v21 = vadd.f32 1.0, %v1772_v20  ;;  %v1773_v22 = vmul.f32 0.3275911, %v1771_v16  ;;  %v1799_v62 = vsub.f32 0.0, %v1771_v16  ;;  %v1800_v26 = vmul.f32 %v1798_v24, %v1770_v18 }
 0xec0   :  { %2350 = vrcp.f32 %v1774_v21  ;;  %v1775_v23 = vadd.f32 1.0, %v1773_v22  ;;  %v1801_v32 = vmul.f32 %v1799_v62, %v1771_v16  ;;  %v1802_v33 = vmul.f32 1.442695, %v1800_v26 }
 0xec2   :  { %2352 = vrcp.f32 %v1775_v23  ;;  %v1804_v29 = vmul.f32 1.442695, %v1801_v32 }
 0xec3   :  { %2354 = vpow2.f32 %v1802_v33 }
 0xec4   :  { %2356 = vpow2.f32 %v1804_v29 }
 0xeca   :  { %v2351_v25 = vpop.eup %2350 }
 0xecb   :  { %v1780_v28 = vmul.f32 1.0614054, %v2351_v25 }
 0xecc   :  { %v2353_v30 = vpop.eup %2352 }
 0xecd   :  { %v1782_v31 = vadd.f32 -1.4531521, %v1780_v28  ;;  %v1781_v34 = vmul.f32 1.0614054, %v2353_v30  ;;  %v2355_v47 = vpop.eup %2354 }
 0xece   :  { %v2357_v53 = vpop.eup %2356 }
 0xecf   :  { %v1784_v35 = vmul.f32 %v2351_v25, %v1782_v31  ;;  %v1783_v38 = vadd.f32 -1.4531521, %v1781_v34 }
 0xed1   :  { %v1786_v5 = vadd.f32 1.4214138, %v1784_v35  ;;  %v1785_v40 = vmul.f32 %v2353_v30, %v1783_v38 }
 0xed3   :  { %v1788_v41 = vmul.f32 %v2351_v25, %v1786_v5  ;;  %v1787_v42 = vadd.f32 1.4214138, %v1785_v40 }
 0xed5   :  { %v1790_v43 = vadd.f32 -0.28449672, %v1788_v41  ;;  %v1789_v44 = vmul.f32 %v2353_v30, %v1787_v42 }
 0xed7   :  { %v1792_v0 = vmul.f32 %v2351_v25, %v1790_v43  ;;  %v1791_v45 = vadd.f32 -0.28449672, %v1789_v44 }
 0xed9   :  { %v1794_v1 = vadd.f32 0.2548296, %v1792_v0  ;;  %v1793_v46 = vmul.f32 %v2353_v30, %v1791_v45 }
 0xedb   :  { %v1796_v27 = vmul.f32 %v2351_v25, %v1794_v1  ;;  %v1795_v48 = vadd.f32 0.2548296, %v1793_v46 }
 0xedd   :  { %v1806_v50 = vmul.f32 %v2355_v47, %v1796_v27  ;;  %v1797_v52 = vmul.f32 %v2353_v30, %v1795_v48 }
 0xedf   :  { %v1808_v54 = vsub.f32 1.0, %v1806_v50  ;;  %v1807_v55 = vmul.f32 %v2357_v53, %v1797_v52 }
 0xee1   :  { %v1812_v56 = vsub.f32 0.0, %v1808_v54  ;;  %v1809_v57 = vsub.f32 1.0, %v1807_v55 }
 0xee3   :  { %v1814_v58 = vsel %vm1810_vm6, %v1808_v54, %v1812_v56  ;;  %v1813_v59 = vsub.f32 0.0, %v1809_v57 }
 0xee4   :  { %v1816_v60 = vadd.f32 1.0, %v1814_v58 }
 0xee5   :  { %v1815_v61 = vsel %vm1811_vm7, %v1809_v57, %v1813_v59 }
 0xee6   :  { %v1817_v3 = vadd.f32 1.0, %v1815_v61  ;;  %v1818_v49 = vmul.f32 %v1816_v60, %v1766_v63 }
 0xee8   :  { %v1819_v4 = vmul.f32 %v1817_v3, %v1767_v2 }
 0xeea   :  { %v1820_v51 = vpack.c.bf16 %v1819_v4, %v1818_v49 }
 0xeec   :  { %2198 = vmatmul.mubr.msk.bf16.vlgmr.msra.gmra.mrb[24].mxu1 %vm1860_vm8, %v1820_v51 }
 0xfbf   :  { %v1898_v7 = vpop.f32.mrb[24].mxu1 }
 0xfc0   :  { %v1899_v36 = vadd.f32 %v1992_v6, %v1898_v7  ;;  %v2199_v8 = vpop.f32.mrb[25].mxu1 }
 0xfc1   :  { %v1901_v9 = vpop.f32.mrb[26].mxu1 }
 0xfc2   :  { %v1905_v10 = vadd.f32 %v1899_v36, %v3214_v37  ;;  %v1902_v11 = vadd.f32 %v1992_v6, %v1901_v9  ;;  %v2200_v12 = vpop.f32.mrb[27].mxu1 }
 0xfc4   :  { %1907 = vst.msk [vmem:[#allocation23] sm:$0xff] %vm249_vm0, %v1905_v10  ;;  %v1906_v13 = vadd.f32 %v1902_v11, %v3217_v39 }
 0xfc6   :  { %1908 = vst.msk [vmem:[#allocation23 + $0x8] sm:$0xff] %vm249_vm0, %v1906_v13 }
 0xfc7   :  { %2655 = shalt.err (!%p2652_p10)
}
 0xfc8   :  { %s3341_s25 = sld [smem:[#allocation43_spill]] }
 0xfce   :  { %s2656_s8 = scalar_lea.hbm %s3341_s25, 256 }
 0xfcf   :  { %p2657_p11 = scmp.ne.s32.totalorder %s3341_s25, %s2656_s8  ;;  %p2660_p12 = scmp.lt.u32.totalorder %s2656_s8, %s3341_s25 }
 0xfd1   :  { %p2662_p13 = pnand %p2660_p12, %p2657_p11 }
 0xfd3   :  { %2665 = shalt.err (!%p2662_p13)
}
 0xfd4   :  { %1920 = dma.vmem_to_hbm [thread:$0]  %s1915_s28, 256, %s3341_s25, [#allocation4], %s2691_s15, %s2691_s15, %s2692_s4  }
 0xfd5   :  { %2680 = dma.done.wait [#allocation4], 256  }
 0xfd6   :  { %2681 = vsyncadd [#allocation4], 4294967040 }
 0xfd7   :  { %1924 = vsyncpa [#allocation3], 1 }
 0xfd8   :  { %1925 = vsyncpa [#allocation6], 1 }
 0xfd9   :  { %1926 = vsyncpa [#allocation9], 1 }
 0xfda   :  { %1927 = vsyncpa [#allocation12], 1 }
 0xfdb   :  { %1928 = vsyncpa [#allocation15], 1 }
 0xfdc   :  { %1929 = vsyncpa [#allocation18], 1 }
 0xfdd   :  { %1930 = vsyncpa [#allocation21], 1 }
 0xfde   :  { %1931 = vsyncpa [#allocation4], 1 }

</bundles_post_ra>
